<compile_context>
chip_gen: v7x
topology: tpu7x:2x2x1
jax: 0.10.0
libtpu: 0.0.40
codegen_flags: <defaults>
</compile_context>

<pallas_src>
import numpy as np
import jax
import jax.numpy as jnp
from jax import lax
from jax.experimental import pallas as pl
from jax.experimental.pallas import tpu as pltpu


# ----------------------------- host-side operators ---------------------------- #

def build_shift_stack(patch):
    """Vertically stacked 3x3 (padding=1) spatial shift operators, k = ky*3 + kx."""
    pp = patch * patch
    s = np.zeros((9, pp, pp), dtype=np.float32)
    for ky in range(3):
        for kx in range(3):
            k = ky * 3 + kx
            for i in range(patch):
                for j in range(patch):
                    ii, jj = i + ky - 1, j + kx - 1
                    if 0 <= ii < patch and 0 <= jj < patch:
                        s[k, i * patch + j, ii * patch + jj] = 1.0
    return s.reshape(9 * pp, pp)


def perm_cat(c, pp):
    """P_cat such that R(o) = P_cat-selection of Wn^T @ [o-block concat]:
    D[r, m] = sum_K P_cat[r, K] * (Wn^T @ O_h)[m, K] reproduces the PyTorch
    CHW-contiguous reshape followed by the next Linear (see derivation in notes)."""
    g = pp // c
    p = np.zeros((pp, g * c), dtype=np.float32)
    for r in range(pp):
        p[r, (r % g) * c + (r // g)] = 1.0
    return p


# ------------------------------- fused kernel --------------------------------- #

def make_forward(hyp, offsets, slab_shape, num_patches):
    patch = hyp["patch"]
    pp = patch * patch
    in_dim = hyp["input_dim"]
    zc = hyp["zc_dim"]
    ng = hyp["n_gmm"]
    c1, c2, c3 = hyp["hidden3_dim"], hyp["hidden2_dim"], hyp["hidden1_dim"]

    def kernel(x_ref, slab_ref, enc4_out, dec_out, z_out, gamma_out):

        def get(name):
            r0, (r, c) = offsets[name]
            return slab_ref[r0:r0 + r, 0:c]

        def mm(a, b):
            return jnp.dot(a, b, preferred_element_type=jnp.float32)

        x = x_ref[...]
        s_all = get("s_all")                                  # (9*pp, pp)

        def linear(h, name, act):
            y = mm(h, get(name + "_w")) + get(name + "_b")
            return jnp.tanh(y) if act else y

        def asc_then_linear(enc, dec, name, c, act):
            g = pp // c
            # Conv2d(2c, c, 1) on concat([enc, dec], channel): one fused matmul.
            y = mm(jnp.concatenate([enc, dec], axis=-1), get(name + "_w1")) + get(name + "_b1")
            y = jnp.where(y > 0.0, y, 0.01 * y)               # LeakyReLU(0.01)
            # Conv2d(c, c, 3, 1, 1): stacked-shift matmul + ONE fused channel matmul.
            v = mm(s_all, y)                                  # (9*pp, c)
            vh = jnp.concatenate([v[k * pp:(k + 1) * pp, :] for k in range(9)],
                                 axis=-1)                     # (pp, 9c)
            acc = mm(vh, get(name + "_w2")) + get(name + "_b2")
            m = 1.0 / (1.0 + jnp.exp(-acc))                   # Sigmoid
            o = (1.0 - m) * enc + m * dec                     # asc blend (HWC layout)
            # PyTorch CHW-contiguous reshape + next decoder Linear, folded into
            # two matmuls with host-precomputed operators (no in-kernel relayout
            # other than a lane-concat of sublane blocks).
            if g > 1:
                oh = jnp.concatenate([o[a * c:(a + 1) * c, :] for a in range(g)],
                                     axis=-1)                 # (c, g*c)
            else:
                oh = o                                        # (c, c) == (c, pp)
            mcat = mm(get(name + "_wnT"), oh)                 # (out, g*c)
            d = get(name + "_bn") + lax.dot_general(
                get(name + "_pcat"), mcat,
                dimension_numbers=(((1,), (1,)), ((), ())),
                preferred_element_type=jnp.float32)           # (pp, out)
            return jnp.tanh(d) if act else d

        # ---- encoder ----
        enc1 = linear(x, "e1", True)
        enc2 = linear(enc1, "e2", True)
        enc3 = linear(enc2, "e3", True)
        enc4 = linear(enc3, "e4", False)

        # ---- decoder with adaptive skip connections ----
        dec = linear(enc4, "d1", True)
        dec = asc_then_linear(enc3, dec, "a1", c1, True)
        dec = asc_then_linear(enc2, dec, "a2", c2, True)
        dec = asc_then_linear(enc1, dec, "a3", c3, False)

        # ---- reconstruction features ----
        dot = jnp.sum(x * dec, axis=-1, keepdims=True)
        nx = jnp.sqrt(jnp.sum(x * x, axis=-1, keepdims=True))
        nd = jnp.sqrt(jnp.sum(dec * dec, axis=-1, keepdims=True))
        cos = dot / jnp.maximum(nx * nd, 1e-8)                # F.cosine_similarity
        diff = x - dec + 1e-6                                 # F.pairwise_distance eps
        euc = jnp.sqrt(jnp.sum(diff * diff, axis=-1, keepdims=True))

        # ---- estimation net (z consumed via a row-split of est1's weight) ----
        # TODO(synk): nn.Dropout reproduced as identity (eval mode); training-mode RNG dropout not modeled.
        h = jnp.tanh(mm(enc4, get("est1_we")) + euc * get("est1_wu")
                     + cos * get("est1_wc") + get("est1_b"))
        logits = mm(h, get("est2_w")) + get("est2_b")
        logits = logits - jnp.max(logits, axis=-1, keepdims=True)
        ex = jnp.exp(logits)
        gamma = ex / jnp.sum(ex, axis=-1, keepdims=True)

        # ---- outputs (z written with a single lane-dense store) ----
        enc4_out[...] = enc4
        dec_out[...] = dec
        z_out[...] = jnp.concatenate([enc4, euc, cos], axis=-1)
        gamma_out[...] = gamma

    out_shape = (
        jax.ShapeDtypeStruct((num_patches * pp, zc), jnp.float32),
        jax.ShapeDtypeStruct((num_patches * pp, in_dim), jnp.float32),
        jax.ShapeDtypeStruct((num_patches * pp, zc + 2), jnp.float32),
        jax.ShapeDtypeStruct((num_patches * pp, ng), jnp.float32),
    )
    return pl.pallas_call(
        kernel,
        grid=(num_patches,),
        in_specs=[
            pl.BlockSpec((pp, in_dim), lambda i: (i, 0)),
            pl.BlockSpec(slab_shape, lambda i: (0, 0)),       # weight slab: VMEM-resident
        ],
        out_specs=(
            pl.BlockSpec((pp, zc), lambda i: (i, 0)),
            pl.BlockSpec((pp, in_dim), lambda i: (i, 0)),
            pl.BlockSpec((pp, zc + 2), lambda i: (i, 0)),
            pl.BlockSpec((pp, ng), lambda i: (i, 0)),
        ),
        out_shape=out_shape,
        compiler_params=pltpu.CompilerParams(dimension_semantics=("parallel",)),
    )


# ---------------------------- parameter handling ------------------------------ #

def init_raw_params(key, hyp):
    """Raw PyTorch-layout parameters (Linear: (in,out)+bias; convs: squeezed 1x1 + 3x3)."""
    ks = jax.random.split(key, 13)

    def lin(k, fan_in, fan_out):
        k1, k2 = jax.random.split(k)
        b = 1.0 / np.sqrt(fan_in)
        return (jax.random.uniform(k1, (fan_in, fan_out), jnp.float32, -b, b),
                jax.random.uniform(k2, (fan_out,), jnp.float32, -b, b))

    def conv_block(k, c):
        k1, k2, k3, k4 = jax.random.split(k, 4)
        b1 = 1.0 / np.sqrt(2 * c)       # Conv2d(2c, c, 1) fan_in
        b2 = 1.0 / np.sqrt(9 * c)       # Conv2d(c, c, 3) fan_in
        return dict(
            w1x1=jax.random.uniform(k1, (c, 2 * c), jnp.float32, -b1, b1),
            b1=jax.random.uniform(k2, (c,), jnp.float32, -b1, b1),
            w3x3=jax.random.uniform(k3, (c, c, 3, 3), jnp.float32, -b2, b2),
            b2=jax.random.uniform(k4, (c,), jnp.float32, -b2, b2),
        )

    p = {}
    p["e1"] = lin(ks[0], hyp["input_dim"], hyp["hidden1_dim"])
    p["e2"] = lin(ks[1], hyp["hidden1_dim"], hyp["hidden2_dim"])
    p["e3"] = lin(ks[2], hyp["hidden2_dim"], hyp["hidden3_dim"])
    p["e4"] = lin(ks[3], hyp["hidden3_dim"], hyp["zc_dim"])
    p["d1"] = lin(ks[4], hyp["zc_dim"], hyp["hidden3_dim"])
    p["d2"] = lin(ks[5], hyp["hidden3_dim"], hyp["hidden2_dim"])
    p["d3"] = lin(ks[6], hyp["hidden2_dim"], hyp["hidden1_dim"])
    p["d4"] = lin(ks[7], hyp["hidden1_dim"], hyp["input_dim"])
    p["est1"] = lin(ks[8], hyp["zc_dim"] + 2, hyp["hidden3_dim"])
    p["est2"] = lin(ks[9], hyp["hidden3_dim"], hyp["n_gmm"])
    p["w1"] = conv_block(ks[10], hyp["hidden3_dim"])
    p["w2"] = conv_block(ks[11], hyp["hidden2_dim"])
    p["w3"] = conv_block(ks[12], hyp["hidden1_dim"])
    # NOTE: concat_layer1/2/3 exist in the PyTorch __init__ but are unused in forward -> omitted.
    return p


def pack_params(raw, hyp):
    """Precompute all in-kernel operators and pack them into ONE f32 slab."""
    patch = hyp["patch"]
    pp = patch * patch
    zc = hyp["zc_dim"]
    assert hyp["batch_size"] == pp, "asc() requires batch_size == patch * patch"

    arrays = {}

    def add_linear(name, key):
        w, b = raw[key]
        arrays[name + "_w"] = np.asarray(w)
        arrays[name + "_b"] = np.asarray(b).reshape(1, -1)

    for name in ("e1", "e2", "e3", "e4", "d1"):
        add_linear(name, name)

    arrays["s_all"] = build_shift_stack(patch)

    for name, conv_key, nxt_key in (("a1", "w1", "d2"), ("a2", "w2", "d3"), ("a3", "w3", "d4")):
        cp = raw[conv_key]
        c = int(np.asarray(cp["b1"]).shape[0])
        assert c <= pp and pp % c == 0, "CHW-reshape fold requires channel count to divide patch**2"
        w1x1 = np.asarray(cp["w1x1"])                          # (c, 2c), PyTorch (out, in)
        w3x3 = np.asarray(cp["w3x3"])                          # (c, c, 3, 3)
        wn, bn = raw[nxt_key]                                  # next decoder Linear (c -> out)
        wn = np.asarray(wn)
        arrays[name + "_w1"] = w1x1.T                          # (2c, c): [enc half ; dec half]
        arrays[name + "_b1"] = np.asarray(cp["b1"]).reshape(1, -1)
        arrays[name + "_w2"] = np.concatenate(
            [w3x3[:, :, k // 3, k % 3].T for k in range(9)], axis=0)   # (9c, c)
        arrays[name + "_b2"] = np.asarray(cp["b2"]).reshape(1, -1)
        arrays[name + "_pcat"] = perm_cat(c, pp)               # (pp, pp)
        arrays[name + "_wnT"] = wn.T                           # (out, c)
        arrays[name + "_bn"] = np.asarray(bn).reshape(1, -1)

    w_est1, b_est1 = raw["est1"]
    w_est2, b_est2 = raw["est2"]
    w_est1 = np.asarray(w_est1)
    arrays["est1_we"] = w_est1[:zc, :]
    arrays["est1_wu"] = w_est1[zc:zc + 1, :]
    arrays["est1_wc"] = w_est1[zc + 1:zc + 2, :]
    arrays["est1_b"] = np.asarray(b_est1).reshape(1, -1)
    arrays["est2_w"] = np.asarray(w_est2)
    arrays["est2_b"] = np.asarray(b_est2).reshape(1, -1)

    # --- pack into one contiguous slab: sublane-aligned row blocks, column 0 start ---
    width = max(a.shape[1] for a in arrays.values())
    offsets, blocks, row = {}, [], 0
    for name, a in arrays.items():
        a = np.asarray(a, np.float32)
        rows_padded = -(-a.shape[0] // 8) * 8
        blk = np.zeros((rows_padded, width), np.float32)
        blk[:a.shape[0], :a.shape[1]] = a
        offsets[name] = (row, (int(a.shape[0]), int(a.shape[1])))
        blocks.append(blk)
        row += rows_padded
    slab = np.concatenate(blocks, axis=0)
    return jnp.asarray(slab), offsets


# --------------------------- pure-JAX reference -------------------------------- #

def reference_forward(raw, x, hyp):
    """Direct re-implementation of the PyTorch forward (for validation only)."""
    hi = jax.lax.Precision.HIGHEST
    patch, bs = hyp["patch"], hyp["batch_size"]

    def lin(h, p):
        return jnp.dot(h, p[0], precision=hi) + p[1]

    def asc(enc, dec, cp):
        c = enc.shape[1]
        e = jnp.transpose(enc.reshape(patch, patch, c), (2, 0, 1))
        d = jnp.transpose(dec.reshape(patch, patch, c), (2, 0, 1))
        inp = jnp.concatenate([e, d], axis=0)
        y = jnp.einsum("oi,ihw->ohw", cp["w1x1"], inp, precision=hi) + cp["b1"][:, None, None]
        y = jnp.where(y > 0, y, 0.01 * y)
        ypad = jnp.pad(y, ((0, 0), (1, 1), (1, 1)))
        acc = jnp.zeros_like(y) + cp["b2"][:, None, None]
        for ky in range(3):
            for kx in range(3):
                acc = acc + jnp.einsum("oi,ihw->ohw", cp["w3x3"][:, :, ky, kx],
                                       ypad[:, ky:ky + patch, kx:kx + patch], precision=hi)
        m = 1.0 / (1.0 + jnp.exp(-acc))
        out = (1.0 - m) * e + m * d
        return out.reshape(bs, -1)

    enc1 = jnp.tanh(lin(x, raw["e1"]))
    enc2 = jnp.tanh(lin(enc1, raw["e2"]))
    enc3 = jnp.tanh(lin(enc2, raw["e3"]))
    enc4 = lin(enc3, raw["e4"])
    dec = jnp.tanh(lin(enc4, raw["d1"]))
    out = asc(enc3, dec, raw["w1"])
    dec = jnp.tanh(lin(out, raw["d2"]))
    out = asc(enc2, dec, raw["w2"])
    dec = jnp.tanh(lin(out, raw["d3"]))
    out = asc(enc1, dec, raw["w3"])
    dec = lin(out, raw["d4"])
    dot = jnp.sum(x * dec, axis=1, keepdims=True)
    nx = jnp.sqrt(jnp.sum(x * x, axis=1, keepdims=True))
    nd = jnp.sqrt(jnp.sum(dec * dec, axis=1, keepdims=True))
    cos = dot / jnp.maximum(nx * nd, 1e-8)
    diff = x - dec + 1e-6
    euc = jnp.sqrt(jnp.sum(diff * diff, axis=1, keepdims=True))
    z = jnp.concatenate([enc4, euc, cos], axis=1)
    h = jnp.tanh(lin(z, raw["est1"]))
    gamma = jax.nn.softmax(lin(h, raw["est2"]), axis=1)
    return enc4, dec, z, gamma


# ----------------------------------- main --------------------------------------- #

if __name__ == "__main__":
    hyp = dict(
        input_dim=32, hidden1_dim=16, hidden2_dim=8, hidden3_dim=4,
        zc_dim=2, n_gmm=4, dropout=0.5,
        patch=4, batch_size=16,            # batch_size == patch * patch (required by asc)
        lambda1=0.1, lambda2=0.005,
    )
    key = jax.random.PRNGKey(0)
    k_param, k_x = jax.random.split(key)

    raw_params = init_raw_params(k_param, hyp)
    slab, offsets = pack_params(raw_params, hyp)

    num_patches = 8                        # independent 16-sample problems per call
    pp = hyp["patch"] * hyp["patch"]
    x = jax.random.normal(k_x, (num_patches * pp, hyp["input_dim"]), dtype=jnp.float32)

    forward = make_forward(hyp, offsets, tuple(slab.shape), num_patches)
    enc4, dec, z, gamma = forward(x, slab)
    jax.block_until_ready((enc4, dec, z, gamma))

    assert enc4.shape == (num_patches * pp, hyp["zc_dim"])
    assert dec.shape == (num_patches * pp, hyp["input_dim"])
    assert z.shape == (num_patches * pp, hyp["zc_dim"] + 2)
    assert gamma.shape == (num_patches * pp, hyp["n_gmm"])

    # Validate each 16-sample patch-batch against a pure-JAX re-implementation of
    # the PyTorch forward (Precision.HIGHEST). Tolerance admits Mosaic's default
    # f32 matmul precision; layout/permutation bugs would give O(1) errors.
    for p in range(num_patches):
        sl = slice(p * pp, (p + 1) * pp)
        refs = reference_forward(raw_params, x[sl], hyp)
        for got, want in zip((enc4[sl], dec[sl], z[sl], gamma[sl]), refs):
            err = float(jnp.max(jnp.abs(got - want)))
            assert jnp.allclose(got, want, atol=3e-2, rtol=3e-2), err

    print("KERNEL_OK")
</pallas_src>

<mosaic_0001>
module attributes {stable_mosaic.version = 11 : i64} {
  func.func @kernel(%arg0: i32, %arg1: memref<16x32xf32, #tpu.memory_space<vmem>>, %arg2: memref<792x32xf32, #tpu.memory_space<vmem>>, %arg3: memref<16x2xf32, #tpu.memory_space<vmem>>, %arg4: memref<16x32xf32, #tpu.memory_space<vmem>>, %arg5: memref<16x4xf32, #tpu.memory_space<vmem>>, %arg6: memref<16x4xf32, #tpu.memory_space<vmem>>) attributes {dimension_semantics = [#tpu.dimension_semantics<parallel>], iteration_bounds = array<i64: 8>, scalar_prefetch = 0 : i64, scratch_operands = 0 : i64, tpu.core_type = #tpu.core_type<tc>, window_params = [{transform_indices = @transform_0, window_bounds = array<i64: 16, 32>}, {pipeline_mode = #tpu.pipeline_mode<synchronous>, transform_indices = @transform_1, window_bounds = array<i64: 792, 32>}, {transform_indices = @transform_2, window_bounds = array<i64: 16, 2>}, {transform_indices = @transform_3, window_bounds = array<i64: 16, 32>}, {transform_indices = @transform_4, window_bounds = array<i64: 16, 4>}, {transform_indices = @transform_5, window_bounds = array<i64: 16, 4>}]} {
    %c0 = arith.constant 0 : index
    %c0_0 = arith.constant 0 : index
    %0 = vector.load %arg1[%c0, %c0_0] : memref<16x32xf32, #tpu.memory_space<vmem>>, vector<16x32xf32>
    %c112 = arith.constant 112 : index
    %c0_1 = arith.constant 0 : index
    %1 = vector.load %arg2[%c112, %c0_1] : memref<792x32xf32, #tpu.memory_space<vmem>>, vector<144x16xf32>
    %c0_2 = arith.constant 0 : index
    %c0_3 = arith.constant 0 : index
    %2 = vector.load %arg2[%c0_2, %c0_3] : memref<792x32xf32, #tpu.memory_space<vmem>>, vector<32x16xf32>
    %cst = arith.constant dense<0.000000e+00> : vector<16x16xf32>
    %3 = tpu.matmul %0, %2, %cst {dimension_numbers = #tpu.dot_dimension_numbers<[1], [0], [0], [1], [0, 0, 1, 1], [], []>} : vector<16x32xf32>, vector<32x16xf32>, vector<16x16xf32> -> vector<16x16xf32>
    %c32 = arith.constant 32 : index
    %c0_4 = arith.constant 0 : index
    %4 = vector.load %arg2[%c32, %c0_4] : memref<792x32xf32, #tpu.memory_space<vmem>>, vector<1x16xf32>
    %5 = vector.broadcast %4 : vector<1x16xf32> to vector<16x16xf32>
    %6 = arith.addf %3, %5 : vector<16x16xf32>
    %7 = math.tanh %6 : vector<16x16xf32>
    %c40 = arith.constant 40 : index
    %c0_5 = arith.constant 0 : index
    %8 = vector.load %arg2[%c40, %c0_5] : memref<792x32xf32, #tpu.memory_space<vmem>>, vector<16x8xf32>
    %cst_6 = arith.constant dense<0.000000e+00> : vector<16x8xf32>
    %9 = tpu.matmul %7, %8, %cst_6 {dimension_numbers = #tpu.dot_dimension_numbers<[1], [0], [0], [1], [0, 0, 1, 1], [], []>} : vector<16x16xf32>, vector<16x8xf32>, vector<16x8xf32> -> vector<16x8xf32>
    %c56 = arith.constant 56 : index
    %c0_7 = arith.constant 0 : index
    %10 = vector.load %arg2[%c56, %c0_7] : memref<792x32xf32, #tpu.memory_space<vmem>>, vector<1x8xf32>
    %11 = vector.broadcast %10 : vector<1x8xf32> to vector<16x8xf32>
    %12 = arith.addf %9, %11 : vector<16x8xf32>
    %13 = math.tanh %12 : vector<16x8xf32>
    %c64 = arith.constant 64 : index
    %c0_8 = arith.constant 0 : index
    %14 = vector.load %arg2[%c64, %c0_8] : memref<792x32xf32, #tpu.memory_space<vmem>>, vector<8x4xf32>
    %cst_9 = arith.constant dense<0.000000e+00> : vector<16x4xf32>
    %15 = tpu.matmul %13, %14, %cst_9 {dimension_numbers = #tpu.dot_dimension_numbers<[1], [0], [0], [1], [0, 0, 1, 1], [], []>} : vector<16x8xf32>, vector<8x4xf32>, vector<16x4xf32> -> vector<16x4xf32>
    %c72 = arith.constant 72 : index
    %c0_10 = arith.constant 0 : index
    %16 = vector.load %arg2[%c72, %c0_10] : memref<792x32xf32, #tpu.memory_space<vmem>>, vector<1x4xf32>
    %17 = vector.broadcast %16 : vector<1x4xf32> to vector<16x4xf32>
    %18 = arith.addf %15, %17 : vector<16x4xf32>
    %19 = math.tanh %18 : vector<16x4xf32>
    %c80 = arith.constant 80 : index
    %c0_11 = arith.constant 0 : index
    %20 = vector.load %arg2[%c80, %c0_11] : memref<792x32xf32, #tpu.memory_space<vmem>>, vector<4x2xf32>
    %cst_12 = arith.constant dense<0.000000e+00> : vector<16x2xf32>
    %21 = tpu.matmul %19, %20, %cst_12 {dimension_numbers = #tpu.dot_dimension_numbers<[1], [0], [0], [1], [0, 0, 1, 1], [], []>} : vector<16x4xf32>, vector<4x2xf32>, vector<16x2xf32> -> vector<16x2xf32>
    %c88 = arith.constant 88 : index
    %c0_13 = arith.constant 0 : index
    %22 = vector.load %arg2[%c88, %c0_13] : memref<792x32xf32, #tpu.memory_space<vmem>>, vector<1x2xf32>
    %23 = vector.broadcast %22 : vector<1x2xf32> to vector<16x2xf32>
    %24 = arith.addf %21, %23 : vector<16x2xf32>
    %c96 = arith.constant 96 : index
    %c0_14 = arith.constant 0 : index
    %25 = vector.load %arg2[%c96, %c0_14] : memref<792x32xf32, #tpu.memory_space<vmem>>, vector<2x4xf32>
    %cst_15 = arith.constant dense<0.000000e+00> : vector<16x4xf32>
    %26 = tpu.matmul %24, %25, %cst_15 {dimension_numbers = #tpu.dot_dimension_numbers<[1], [0], [0], [1], [0, 0, 1, 1], [], []>} : vector<16x2xf32>, vector<2x4xf32>, vector<16x4xf32> -> vector<16x4xf32>
    %c104 = arith.constant 104 : index
    %c0_16 = arith.constant 0 : index
    %27 = vector.load %arg2[%c104, %c0_16] : memref<792x32xf32, #tpu.memory_space<vmem>>, vector<1x4xf32>
    %28 = vector.broadcast %27 : vector<1x4xf32> to vector<16x4xf32>
    %29 = arith.addf %26, %28 : vector<16x4xf32>
    %30 = math.tanh %29 : vector<16x4xf32>
    %31 = tpu.concatenate %19, %30 in 1 : vector<16x4xf32>, vector<16x4xf32> -> vector<16x8xf32>
    %c256 = arith.constant 256 : index
    %c0_17 = arith.constant 0 : index
    %32 = vector.load %arg2[%c256, %c0_17] : memref<792x32xf32, #tpu.memory_space<vmem>>, vector<8x4xf32>
    %cst_18 = arith.constant dense<0.000000e+00> : vector<16x4xf32>
    %33 = tpu.matmul %31, %32, %cst_18 {dimension_numbers = #tpu.dot_dimension_numbers<[1], [0], [0], [1], [0, 0, 1, 1], [], []>} : vector<16x8xf32>, vector<8x4xf32>, vector<16x4xf32> -> vector<16x4xf32>
    %c264 = arith.constant 264 : index
    %c0_19 = arith.constant 0 : index
    %34 = vector.load %arg2[%c264, %c0_19] : memref<792x32xf32, #tpu.memory_space<vmem>>, vector<1x4xf32>
    %35 = vector.broadcast %34 : vector<1x4xf32> to vector<16x4xf32>
    %36 = arith.addf %33, %35 : vector<16x4xf32>
    %cst_20 = arith.constant 0.000000e+00 : f32
    %37 = vector.broadcast %cst_20 : f32 to vector<16x4xf32>
    %38 = arith.cmpf ogt, %36, %37 : vector<16x4xf32>
    %cst_21 = arith.constant 0.00999999977 : f32
    %39 = vector.broadcast %cst_21 : f32 to vector<16x4xf32>
    %40 = arith.mulf %39, %36 : vector<16x4xf32>
    %41 = arith.select %38, %36, %40 : vector<16x4xi1>, vector<16x4xf32>
    %cst_22 = arith.constant dense<0.000000e+00> : vector<144x4xf32>
    %42 = tpu.matmul %1, %41, %cst_22 {dimension_numbers = #tpu.dot_dimension_numbers<[1], [0], [0], [1], [0, 0, 1, 1], [], []>} : vector<144x16xf32>, vector<16x4xf32>, vector<144x4xf32> -> vector<144x4xf32>
    %43 = vector.extract_strided_slice %42 {offsets = [0, 0], sizes = [16, 4], strides = [1, 1]} : vector<144x4xf32> to vector<16x4xf32>
    %44 = vector.extract_strided_slice %42 {offsets = [16, 0], sizes = [16, 4], strides = [1, 1]} : vector<144x4xf32> to vector<16x4xf32>
    %45 = vector.extract_strided_slice %42 {offsets = [32, 0], sizes = [16, 4], strides = [1, 1]} : vector<144x4xf32> to vector<16x4xf32>
    %46 = vector.extract_strided_slice %42 {offsets = [48, 0], sizes = [16, 4], strides = [1, 1]} : vector<144x4xf32> to vector<16x4xf32>
    %47 = vector.extract_strided_slice %42 {offsets = [64, 0], sizes = [16, 4], strides = [1, 1]} : vector<144x4xf32> to vector<16x4xf32>
    %48 = vector.extract_strided_slice %42 {offsets = [80, 0], sizes = [16, 4], strides = [1, 1]} : vector<144x4xf32> to vector<16x4xf32>
    %49 = vector.extract_strided_slice %42 {offsets = [96, 0], sizes = [16, 4], strides = [1, 1]} : vector<144x4xf32> to vector<16x4xf32>
    %50 = vector.extract_strided_slice %42 {offsets = [112, 0], sizes = [16, 4], strides = [1, 1]} : vector<144x4xf32> to vector<16x4xf32>
    %51 = vector.extract_strided_slice %42 {offsets = [128, 0], sizes = [16, 4], strides = [1, 1]} : vector<144x4xf32> to vector<16x4xf32>
    %52 = tpu.concatenate %43, %44, %45, %46, %47, %48, %49, %50, %51 in 1 : vector<16x4xf32>, vector<16x4xf32>, vector<16x4xf32>, vector<16x4xf32>, vector<16x4xf32>, vector<16x4xf32>, vector<16x4xf32>, vector<16x4xf32>, vector<16x4xf32> -> vector<16x36xf32>
    %c272 = arith.constant 272 : index
    %c0_23 = arith.constant 0 : index
    %53 = vector.load %arg2[%c272, %c0_23] : memref<792x32xf32, #tpu.memory_space<vmem>>, vector<36x4xf32>
    %cst_24 = arith.constant dense<0.000000e+00> : vector<16x4xf32>
    %54 = tpu.matmul %52, %53, %cst_24 {dimension_numbers = #tpu.dot_dimension_numbers<[1], [0], [0], [1], [0, 0, 1, 1], [], []>} : vector<16x36xf32>, vector<36x4xf32>, vector<16x4xf32> -> vector<16x4xf32>
    %c312 = arith.constant 312 : index
    %c0_25 = arith.constant 0 : index
    %55 = vector.load %arg2[%c312, %c0_25] : memref<792x32xf32, #tpu.memory_space<vmem>>, vector<1x4xf32>
    %56 = vector.broadcast %55 : vector<1x4xf32> to vector<16x4xf32>
    %57 = arith.addf %54, %56 : vector<16x4xf32>
    %cst_26 = arith.constant 0.000000e+00 : f32
    %58 = vector.broadcast %cst_26 : f32 to vector<16x4xf32>
    %59 = arith.subf %58, %57 : vector<16x4xf32>
    %60 = math.exp %59 : vector<16x4xf32>
    %cst_27 = arith.constant 1.000000e+00 : f32
    %61 = vector.broadcast %cst_27 : f32 to vector<16x4xf32>
    %62 = arith.addf %61, %60 : vector<16x4xf32>
    %cst_28 = arith.constant 1.000000e+00 : f32
    %63 = vector.broadcast %cst_28 : f32 to vector<16x4xf32>
    %64 = arith.divf %63, %62 : vector<16x4xf32>
    %cst_29 = arith.constant 1.000000e+00 : f32
    %65 = vector.broadcast %cst_29 : f32 to vector<16x4xf32>
    %66 = arith.subf %65, %64 : vector<16x4xf32>
    %67 = arith.mulf %66, %19 : vector<16x4xf32>
    %68 = arith.mulf %64, %30 : vector<16x4xf32>
    %69 = arith.addf %67, %68 : vector<16x4xf32>
    %70 = vector.extract_strided_slice %69 {offsets = [0, 0], sizes = [4, 4], strides = [1, 1]} : vector<16x4xf32> to vector<4x4xf32>
    %71 = vector.extract_strided_slice %69 {offsets = [4, 0], sizes = [4, 4], strides = [1, 1]} : vector<16x4xf32> to vector<4x4xf32>
    %72 = vector.extract_strided_slice %69 {offsets = [8, 0], sizes = [4, 4], strides = [1, 1]} : vector<16x4xf32> to vector<4x4xf32>
    %73 = vector.extract_strided_slice %69 {offsets = [12, 0], sizes = [4, 4], strides = [1, 1]} : vector<16x4xf32> to vector<4x4xf32>
    %74 = tpu.concatenate %70, %71, %72, %73 in 1 : vector<4x4xf32>, vector<4x4xf32>, vector<4x4xf32>, vector<4x4xf32> -> vector<4x16xf32>
    %c336 = arith.constant 336 : index
    %c0_30 = arith.constant 0 : index
    %75 = vector.load %arg2[%c336, %c0_30] : memref<792x32xf32, #tpu.memory_space<vmem>>, vector<8x4xf32>
    %cst_31 = arith.constant dense<0.000000e+00> : vector<8x16xf32>
    %76 = tpu.matmul %75, %74, %cst_31 {dimension_numbers = #tpu.dot_dimension_numbers<[1], [0], [0], [1], [0, 0, 1, 1], [], []>} : vector<8x4xf32>, vector<4x16xf32>, vector<8x16xf32> -> vector<8x16xf32>
    %c344 = arith.constant 344 : index
    %c0_32 = arith.constant 0 : index
    %77 = vector.load %arg2[%c344, %c0_32] : memref<792x32xf32, #tpu.memory_space<vmem>>, vector<1x8xf32>
    %c320 = arith.constant 320 : index
    %c0_33 = arith.constant 0 : index
    %78 = vector.load %arg2[%c320, %c0_33] : memref<792x32xf32, #tpu.memory_space<vmem>>, vector<16x16xf32>
    %cst_34 = arith.constant dense<0.000000e+00> : vector<16x8xf32>
    %79 = tpu.matmul %78, %76, %cst_34 {dimension_numbers = #tpu.dot_dimension_numbers<[1], [1], [0], [0], [0, 0, 1, 0], [], []>} : vector<16x16xf32>, vector<8x16xf32>, vector<16x8xf32> -> vector<16x8xf32>
    %80 = vector.broadcast %77 : vector<1x8xf32> to vector<16x8xf32>
    %81 = arith.addf %80, %79 : vector<16x8xf32>
    %82 = math.tanh %81 : vector<16x8xf32>
    %83 = tpu.concatenate %13, %82 in 1 : vector<16x8xf32>, vector<16x8xf32> -> vector<16x16xf32>
    %c352 = arith.constant 352 : index
    %c0_35 = arith.constant 0 : index
    %84 = vector.load %arg2[%c352, %c0_35] : memref<792x32xf32, #tpu.memory_space<vmem>>, vector<16x8xf32>
    %cst_36 = arith.constant dense<0.000000e+00> : vector<16x8xf32>
    %85 = tpu.matmul %83, %84, %cst_36 {dimension_numbers = #tpu.dot_dimension_numbers<[1], [0], [0], [1], [0, 0, 1, 1], [], []>} : vector<16x16xf32>, vector<16x8xf32>, vector<16x8xf32> -> vector<16x8xf32>
    %c368 = arith.constant 368 : index
    %c0_37 = arith.constant 0 : index
    %86 = vector.load %arg2[%c368, %c0_37] : memref<792x32xf32, #tpu.memory_space<vmem>>, vector<1x8xf32>
    %87 = vector.broadcast %86 : vector<1x8xf32> to vector<16x8xf32>
    %88 = arith.addf %85, %87 : vector<16x8xf32>
    %cst_38 = arith.constant 0.000000e+00 : f32
    %89 = vector.broadcast %cst_38 : f32 to vector<16x8xf32>
    %90 = arith.cmpf ogt, %88, %89 : vector<16x8xf32>
    %cst_39 = arith.constant 0.00999999977 : f32
    %91 = vector.broadcast %cst_39 : f32 to vector<16x8xf32>
    %92 = arith.mulf %91, %88 : vector<16x8xf32>
    %93 = arith.select %90, %88, %92 : vector<16x8xi1>, vector<16x8xf32>
    %cst_40 = arith.constant dense<0.000000e+00> : vector<144x8xf32>
    %94 = tpu.matmul %1, %93, %cst_40 {dimension_numbers = #tpu.dot_dimension_numbers<[1], [0], [0], [1], [0, 0, 1, 1], [], []>} : vector<144x16xf32>, vector<16x8xf32>, vector<144x8xf32> -> vector<144x8xf32>
    %95 = vector.extract_strided_slice %94 {offsets = [0, 0], sizes = [16, 8], strides = [1, 1]} : vector<144x8xf32> to vector<16x8xf32>
    %96 = vector.extract_strided_slice %94 {offsets = [16, 0], sizes = [16, 8], strides = [1, 1]} : vector<144x8xf32> to vector<16x8xf32>
    %97 = vector.extract_strided_slice %94 {offsets = [32, 0], sizes = [16, 8], strides = [1, 1]} : vector<144x8xf32> to vector<16x8xf32>
    %98 = vector.extract_strided_slice %94 {offsets = [48, 0], sizes = [16, 8], strides = [1, 1]} : vector<144x8xf32> to vector<16x8xf32>
    %99 = vector.extract_strided_slice %94 {offsets = [64, 0], sizes = [16, 8], strides = [1, 1]} : vector<144x8xf32> to vector<16x8xf32>
    %100 = vector.extract_strided_slice %94 {offsets = [80, 0], sizes = [16, 8], strides = [1, 1]} : vector<144x8xf32> to vector<16x8xf32>
    %101 = vector.extract_strided_slice %94 {offsets = [96, 0], sizes = [16, 8], strides = [1, 1]} : vector<144x8xf32> to vector<16x8xf32>
    %102 = vector.extract_strided_slice %94 {offsets = [112, 0], sizes = [16, 8], strides = [1, 1]} : vector<144x8xf32> to vector<16x8xf32>
    %103 = vector.extract_strided_slice %94 {offsets = [128, 0], sizes = [16, 8], strides = [1, 1]} : vector<144x8xf32> to vector<16x8xf32>
    %104 = tpu.concatenate %95, %96, %97, %98, %99, %100, %101, %102, %103 in 1 : vector<16x8xf32>, vector<16x8xf32>, vector<16x8xf32>, vector<16x8xf32>, vector<16x8xf32>, vector<16x8xf32>, vector<16x8xf32>, vector<16x8xf32>, vector<16x8xf32> -> vector<16x72xf32>
    %c376 = arith.constant 376 : index
    %c0_41 = arith.constant 0 : index
    %105 = vector.load %arg2[%c376, %c0_41] : memref<792x32xf32, #tpu.memory_space<vmem>>, vector<72x8xf32>
    %cst_42 = arith.constant dense<0.000000e+00> : vector<16x8xf32>
    %106 = tpu.matmul %104, %105, %cst_42 {dimension_numbers = #tpu.dot_dimension_numbers<[1], [0], [0], [1], [0, 0, 1, 1], [], []>} : vector<16x72xf32>, vector<72x8xf32>, vector<16x8xf32> -> vector<16x8xf32>
    %c448 = arith.constant 448 : index
    %c0_43 = arith.constant 0 : index
    %107 = vector.load %arg2[%c448, %c0_43] : memref<792x32xf32, #tpu.memory_space<vmem>>, vector<1x8xf32>
    %108 = vector.broadcast %107 : vector<1x8xf32> to vector<16x8xf32>
    %109 = arith.addf %106, %108 : vector<16x8xf32>
    %cst_44 = arith.constant 0.000000e+00 : f32
    %110 = vector.broadcast %cst_44 : f32 to vector<16x8xf32>
    %111 = arith.subf %110, %109 : vector<16x8xf32>
    %112 = math.exp %111 : vector<16x8xf32>
    %cst_45 = arith.constant 1.000000e+00 : f32
    %113 = vector.broadcast %cst_45 : f32 to vector<16x8xf32>
    %114 = arith.addf %113, %112 : vector<16x8xf32>
    %cst_46 = arith.constant 1.000000e+00 : f32
    %115 = vector.broadcast %cst_46 : f32 to vector<16x8xf32>
    %116 = arith.divf %115, %114 : vector<16x8xf32>
    %cst_47 = arith.constant 1.000000e+00 : f32
    %117 = vector.broadcast %cst_47 : f32 to vector<16x8xf32>
    %118 = arith.subf %117, %116 : vector<16x8xf32>
    %119 = arith.mulf %118, %13 : vector<16x8xf32>
    %120 = arith.mulf %116, %82 : vector<16x8xf32>
    %121 = arith.addf %119, %120 : vector<16x8xf32>
    %122 = vector.extract_strided_slice %121 {offsets = [0, 0], sizes = [8, 8], strides = [1, 1]} : vector<16x8xf32> to vector<8x8xf32>
    %123 = vector.extract_strided_slice %121 {offsets = [8, 0], sizes = [8, 8], strides = [1, 1]} : vector<16x8xf32> to vector<8x8xf32>
    %124 = tpu.concatenate %122, %123 in 1 : vector<8x8xf32>, vector<8x8xf32> -> vector<8x16xf32>
    %c472 = arith.constant 472 : index
    %c0_48 = arith.constant 0 : index
    %125 = vector.load %arg2[%c472, %c0_48] : memref<792x32xf32, #tpu.memory_space<vmem>>, vector<16x8xf32>
    %cst_49 = arith.constant dense<0.000000e+00> : vector<16x16xf32>
    %126 = tpu.matmul %125, %124, %cst_49 {dimension_numbers = #tpu.dot_dimension_numbers<[1], [0], [0], [1], [0, 0, 1, 1], [], []>} : vector<16x8xf32>, vector<8x16xf32>, vector<16x16xf32> -> vector<16x16xf32>
    %c488 = arith.constant 488 : index
    %c0_50 = arith.constant 0 : index
    %127 = vector.load %arg2[%c488, %c0_50] : memref<792x32xf32, #tpu.memory_space<vmem>>, vector<1x16xf32>
    %c456 = arith.constant 456 : index
    %c0_51 = arith.constant 0 : index
    %128 = vector.load %arg2[%c456, %c0_51] : memref<792x32xf32, #tpu.memory_space<vmem>>, vector<16x16xf32>
    %cst_52 = arith.constant dense<0.000000e+00> : vector<16x16xf32>
    %129 = tpu.matmul %128, %126, %cst_52 {dimension_numbers = #tpu.dot_dimension_numbers<[1], [1], [0], [0], [0, 0, 1, 0], [], []>} : vector<16x16xf32>, vector<16x16xf32>, vector<16x16xf32> -> vector<16x16xf32>
    %130 = vector.broadcast %127 : vector<1x16xf32> to vector<16x16xf32>
    %131 = arith.addf %130, %129 : vector<16x16xf32>
    %132 = math.tanh %131 : vector<16x16xf32>
    %133 = tpu.concatenate %7, %132 in 1 : vector<16x16xf32>, vector<16x16xf32> -> vector<16x32xf32>
    %c496 = arith.constant 496 : index
    %c0_53 = arith.constant 0 : index
    %134 = vector.load %arg2[%c496, %c0_53] : memref<792x32xf32, #tpu.memory_space<vmem>>, vector<32x16xf32>
    %cst_54 = arith.constant dense<0.000000e+00> : vector<16x16xf32>
    %135 = tpu.matmul %133, %134, %cst_54 {dimension_numbers = #tpu.dot_dimension_numbers<[1], [0], [0], [1], [0, 0, 1, 1], [], []>} : vector<16x32xf32>, vector<32x16xf32>, vector<16x16xf32> -> vector<16x16xf32>
    %c528 = arith.constant 528 : index
    %c0_55 = arith.constant 0 : index
    %136 = vector.load %arg2[%c528, %c0_55] : memref<792x32xf32, #tpu.memory_space<vmem>>, vector<1x16xf32>
    %137 = vector.broadcast %136 : vector<1x16xf32> to vector<16x16xf32>
    %138 = arith.addf %135, %137 : vector<16x16xf32>
    %cst_56 = arith.constant 0.000000e+00 : f32
    %139 = vector.broadcast %cst_56 : f32 to vector<16x16xf32>
    %140 = arith.cmpf ogt, %138, %139 : vector<16x16xf32>
    %cst_57 = arith.constant 0.00999999977 : f32
    %141 = vector.broadcast %cst_57 : f32 to vector<16x16xf32>
    %142 = arith.mulf %141, %138 : vector<16x16xf32>
    %143 = arith.select %140, %138, %142 : vector<16x16xi1>, vector<16x16xf32>
    %cst_58 = arith.constant dense<0.000000e+00> : vector<144x16xf32>
    %144 = tpu.matmul %1, %143, %cst_58 {dimension_numbers = #tpu.dot_dimension_numbers<[1], [0], [0], [1], [0, 0, 1, 1], [], []>} : vector<144x16xf32>, vector<16x16xf32>, vector<144x16xf32> -> vector<144x16xf32>
    %145 = vector.extract_strided_slice %144 {offsets = [0, 0], sizes = [16, 16], strides = [1, 1]} : vector<144x16xf32> to vector<16x16xf32>
    %146 = vector.extract_strided_slice %144 {offsets = [16, 0], sizes = [16, 16], strides = [1, 1]} : vector<144x16xf32> to vector<16x16xf32>
    %147 = vector.extract_strided_slice %144 {offsets = [32, 0], sizes = [16, 16], strides = [1, 1]} : vector<144x16xf32> to vector<16x16xf32>
    %148 = vector.extract_strided_slice %144 {offsets = [48, 0], sizes = [16, 16], strides = [1, 1]} : vector<144x16xf32> to vector<16x16xf32>
    %149 = vector.extract_strided_slice %144 {offsets = [64, 0], sizes = [16, 16], strides = [1, 1]} : vector<144x16xf32> to vector<16x16xf32>
    %150 = vector.extract_strided_slice %144 {offsets = [80, 0], sizes = [16, 16], strides = [1, 1]} : vector<144x16xf32> to vector<16x16xf32>
    %151 = vector.extract_strided_slice %144 {offsets = [96, 0], sizes = [16, 16], strides = [1, 1]} : vector<144x16xf32> to vector<16x16xf32>
    %152 = vector.extract_strided_slice %144 {offsets = [112, 0], sizes = [16, 16], strides = [1, 1]} : vector<144x16xf32> to vector<16x16xf32>
    %153 = vector.extract_strided_slice %144 {offsets = [128, 0], sizes = [16, 16], strides = [1, 1]} : vector<144x16xf32> to vector<16x16xf32>
    %154 = tpu.concatenate %145, %146, %147, %148, %149, %150, %151, %152, %153 in 1 : vector<16x16xf32>, vector<16x16xf32>, vector<16x16xf32>, vector<16x16xf32>, vector<16x16xf32>, vector<16x16xf32>, vector<16x16xf32>, vector<16x16xf32>, vector<16x16xf32> -> vector<16x144xf32>
    %c536 = arith.constant 536 : index
    %c0_59 = arith.constant 0 : index
    %155 = vector.load %arg2[%c536, %c0_59] : memref<792x32xf32, #tpu.memory_space<vmem>>, vector<144x16xf32>
    %cst_60 = arith.constant dense<0.000000e+00> : vector<16x16xf32>
    %156 = tpu.matmul %154, %155, %cst_60 {dimension_numbers = #tpu.dot_dimension_numbers<[1], [0], [0], [1], [0, 0, 1, 1], [], []>} : vector<16x144xf32>, vector<144x16xf32>, vector<16x16xf32> -> vector<16x16xf32>
    %c680 = arith.constant 680 : index
    %c0_61 = arith.constant 0 : index
    %157 = vector.load %arg2[%c680, %c0_61] : memref<792x32xf32, #tpu.memory_space<vmem>>, vector<1x16xf32>
    %158 = vector.broadcast %157 : vector<1x16xf32> to vector<16x16xf32>
    %159 = arith.addf %156, %158 : vector<16x16xf32>
    %cst_62 = arith.constant 0.000000e+00 : f32
    %160 = vector.broadcast %cst_62 : f32 to vector<16x16xf32>
    %161 = arith.subf %160, %159 : vector<16x16xf32>
    %162 = math.exp %161 : vector<16x16xf32>
    %cst_63 = arith.constant 1.000000e+00 : f32
    %163 = vector.broadcast %cst_63 : f32 to vector<16x16xf32>
    %164 = arith.addf %163, %162 : vector<16x16xf32>
    %cst_64 = arith.constant 1.000000e+00 : f32
    %165 = vector.broadcast %cst_64 : f32 to vector<16x16xf32>
    %166 = arith.divf %165, %164 : vector<16x16xf32>
    %cst_65 = arith.constant 1.000000e+00 : f32
    %167 = vector.broadcast %cst_65 : f32 to vector<16x16xf32>
    %168 = arith.subf %167, %166 : vector<16x16xf32>
    %169 = arith.mulf %168, %7 : vector<16x16xf32>
    %170 = arith.mulf %166, %132 : vector<16x16xf32>
    %171 = arith.addf %169, %170 : vector<16x16xf32>
    %c704 = arith.constant 704 : index
    %c0_66 = arith.constant 0 : index
    %172 = vector.load %arg2[%c704, %c0_66] : memref<792x32xf32, #tpu.memory_space<vmem>>, vector<32x16xf32>
    %cst_67 = arith.constant dense<0.000000e+00> : vector<32x16xf32>
    %173 = tpu.matmul %172, %171, %cst_67 {dimension_numbers = #tpu.dot_dimension_numbers<[1], [0], [0], [1], [0, 0, 1, 1], [], []>} : vector<32x16xf32>, vector<16x16xf32>, vector<32x16xf32> -> vector<32x16xf32>
    %c736 = arith.constant 736 : index
    %c0_68 = arith.constant 0 : index
    %174 = vector.load %arg2[%c736, %c0_68] : memref<792x32xf32, #tpu.memory_space<vmem>>, vector<1x32xf32>
    %c688 = arith.constant 688 : index
    %c0_69 = arith.constant 0 : index
    %175 = vector.load %arg2[%c688, %c0_69] : memref<792x32xf32, #tpu.memory_space<vmem>>, vector<16x16xf32>
    %cst_70 = arith.constant dense<0.000000e+00> : vector<16x32xf32>
    %176 = tpu.matmul %175, %173, %cst_70 {dimension_numbers = #tpu.dot_dimension_numbers<[1], [1], [0], [0], [0, 0, 1, 0], [], []>} : vector<16x16xf32>, vector<32x16xf32>, vector<16x32xf32> -> vector<16x32xf32>
    %177 = vector.broadcast %174 : vector<1x32xf32> to vector<16x32xf32>
    %178 = arith.addf %177, %176 : vector<16x32xf32>
    %179 = arith.mulf %0, %178 : vector<16x32xf32>
    %cst_71 = arith.constant dense<0.000000e+00> : vector<16xf32>
    %180 = vector.multi_reduction <add>, %179, %cst_71 [1] : vector<16x32xf32> to vector<16xf32>
    %181 = vector.shape_cast %180 : vector<16xf32> to vector<16x1xf32>
    %182 = arith.mulf %0, %0 : vector<16x32xf32>
    %cst_72 = arith.constant dense<0.000000e+00> : vector<16xf32>
    %183 = vector.multi_reduction <add>, %182, %cst_72 [1] : vector<16x32xf32> to vector<16xf32>
    %184 = vector.shape_cast %183 : vector<16xf32> to vector<16x1xf32>
    %185 = math.sqrt %184 : vector<16x1xf32>
    %186 = arith.mulf %178, %178 : vector<16x32xf32>
    %cst_73 = arith.constant dense<0.000000e+00> : vector<16xf32>
    %187 = vector.multi_reduction <add>, %186, %cst_73 [1] : vector<16x32xf32> to vector<16xf32>
    %188 = vector.shape_cast %187 : vector<16xf32> to vector<16x1xf32>
    %189 = math.sqrt %188 : vector<16x1xf32>
    %190 = arith.mulf %185, %189 : vector<16x1xf32>
    %cst_74 = arith.constant 9.99999993E-9 : f32
    %191 = vector.broadcast %cst_74 : f32 to vector<16x1xf32>
    %192 = arith.maximumf %190, %191 : vector<16x1xf32>
    %193 = arith.divf %181, %192 : vector<16x1xf32>
    %194 = arith.subf %0, %178 : vector<16x32xf32>
    %cst_75 = arith.constant 9.99999997E-7 : f32
    %195 = vector.broadcast %cst_75 : f32 to vector<16x32xf32>
    %196 = arith.addf %194, %195 : vector<16x32xf32>
    %197 = arith.mulf %196, %196 : vector<16x32xf32>
    %cst_76 = arith.constant dense<0.000000e+00> : vector<16xf32>
    %198 = vector.multi_reduction <add>, %197, %cst_76 [1] : vector<16x32xf32> to vector<16xf32>
    %199 = vector.shape_cast %198 : vector<16xf32> to vector<16x1xf32>
    %200 = math.sqrt %199 : vector<16x1xf32>
    %c744 = arith.constant 744 : index
    %c0_77 = arith.constant 0 : index
    %201 = vector.load %arg2[%c744, %c0_77] : memref<792x32xf32, #tpu.memory_space<vmem>>, vector<2x4xf32>
    %cst_78 = arith.constant dense<0.000000e+00> : vector<16x4xf32>
    %202 = tpu.matmul %24, %201, %cst_78 {dimension_numbers = #tpu.dot_dimension_numbers<[1], [0], [0], [1], [0, 0, 1, 1], [], []>} : vector<16x2xf32>, vector<2x4xf32>, vector<16x4xf32> -> vector<16x4xf32>
    %c752 = arith.constant 752 : index
    %c0_79 = arith.constant 0 : index
    %203 = vector.load %arg2[%c752, %c0_79] : memref<792x32xf32, #tpu.memory_space<vmem>>, vector<1x4xf32>
    %204 = vector.broadcast %200 : vector<16x1xf32> to vector<16x4xf32>
    %205 = vector.broadcast %203 : vector<1x4xf32> to vector<16x4xf32>
    %206 = arith.mulf %204, %205 : vector<16x4xf32>
    %207 = arith.addf %202, %206 : vector<16x4xf32>
    %c760 = arith.constant 760 : index
    %c0_80 = arith.constant 0 : index
    %208 = vector.load %arg2[%c760, %c0_80] : memref<792x32xf32, #tpu.memory_space<vmem>>, vector<1x4xf32>
    %209 = vector.broadcast %193 : vector<16x1xf32> to vector<16x4xf32>
    %210 = vector.broadcast %208 : vector<1x4xf32> to vector<16x4xf32>
    %211 = arith.mulf %209, %210 : vector<16x4xf32>
    %212 = arith.addf %207, %211 : vector<16x4xf32>
    %c768 = arith.constant 768 : index
    %c0_81 = arith.constant 0 : index
    %213 = vector.load %arg2[%c768, %c0_81] : memref<792x32xf32, #tpu.memory_space<vmem>>, vector<1x4xf32>
    %214 = vector.broadcast %213 : vector<1x4xf32> to vector<16x4xf32>
    %215 = arith.addf %212, %214 : vector<16x4xf32>
    %216 = math.tanh %215 : vector<16x4xf32>
    %c776 = arith.constant 776 : index
    %c0_82 = arith.constant 0 : index
    %217 = vector.load %arg2[%c776, %c0_82] : memref<792x32xf32, #tpu.memory_space<vmem>>, vector<4x4xf32>
    %cst_83 = arith.constant dense<0.000000e+00> : vector<16x4xf32>
    %218 = tpu.matmul %216, %217, %cst_83 {dimension_numbers = #tpu.dot_dimension_numbers<[1], [0], [0], [1], [0, 0, 1, 1], [], []>} : vector<16x4xf32>, vector<4x4xf32>, vector<16x4xf32> -> vector<16x4xf32>
    %c784 = arith.constant 784 : index
    %c0_84 = arith.constant 0 : index
    %219 = vector.load %arg2[%c784, %c0_84] : memref<792x32xf32, #tpu.memory_space<vmem>>, vector<1x4xf32>
    %220 = vector.broadcast %219 : vector<1x4xf32> to vector<16x4xf32>
    %221 = arith.addf %218, %220 : vector<16x4xf32>
    %cst_85 = arith.constant dense<0xFF800000> : vector<16xf32>
    %222 = vector.multi_reduction <maximumf>, %221, %cst_85 [1] : vector<16x4xf32> to vector<16xf32>
    %223 = vector.shape_cast %222 : vector<16xf32> to vector<16x1xf32>
    %224 = vector.broadcast %223 : vector<16x1xf32> to vector<16x4xf32>
    %225 = arith.subf %221, %224 : vector<16x4xf32>
    %226 = math.exp %225 : vector<16x4xf32>
    %cst_86 = arith.constant dense<0.000000e+00> : vector<16xf32>
    %227 = vector.multi_reduction <add>, %226, %cst_86 [1] : vector<16x4xf32> to vector<16xf32>
    %228 = vector.shape_cast %227 : vector<16xf32> to vector<16x1xf32>
    %229 = vector.broadcast %228 : vector<16x1xf32> to vector<16x4xf32>
    %230 = arith.divf %226, %229 : vector<16x4xf32>
    %c0_87 = arith.constant 0 : index
    %c0_88 = arith.constant 0 : index
    %231 = vector.load %arg3[%c0_87, %c0_88] : memref<16x2xf32, #tpu.memory_space<vmem>>, vector<16x2xf32>
    tpu.vector_store %arg3[%c0_87, %c0_88], %24 {strides = array<i32>} : memref<16x2xf32, #tpu.memory_space<vmem>>, vector<16x2xf32>,
    %c0_89 = arith.constant 0 : index
    %c0_90 = arith.constant 0 : index
    %232 = vector.load %arg4[%c0_89, %c0_90] : memref<16x32xf32, #tpu.memory_space<vmem>>, vector<16x32xf32>
    tpu.vector_store %arg4[%c0_89, %c0_90], %178 {strides = array<i32>} : memref<16x32xf32, #tpu.memory_space<vmem>>, vector<16x32xf32>,
    %233 = tpu.concatenate %24, %200, %193 in 1 : vector<16x2xf32>, vector<16x1xf32>, vector<16x1xf32> -> vector<16x4xf32>
    %c0_91 = arith.constant 0 : index
    %c0_92 = arith.constant 0 : index
    %234 = vector.load %arg5[%c0_91, %c0_92] : memref<16x4xf32, #tpu.memory_space<vmem>>, vector<16x4xf32>
    tpu.vector_store %arg5[%c0_91, %c0_92], %233 {strides = array<i32>} : memref<16x4xf32, #tpu.memory_space<vmem>>, vector<16x4xf32>,
    %c0_93 = arith.constant 0 : index
    %c0_94 = arith.constant 0 : index
    %235 = vector.load %arg6[%c0_93, %c0_94] : memref<16x4xf32, #tpu.memory_space<vmem>>, vector<16x4xf32>
    tpu.vector_store %arg6[%c0_93, %c0_94], %230 {strides = array<i32>} : memref<16x4xf32, #tpu.memory_space<vmem>>, vector<16x4xf32>,
    return
  }
  func.func @transform_0(%arg0: i32) -> (i32, i32) {
    %c0_i32 = arith.constant 0 : i32
    %c0_i32_0 = arith.constant 0 : i32
    return %arg0, %c0_i32 : i32, i32
  }
  func.func @transform_1(%arg0: i32) -> (i32, i32) {
    %c0_i32 = arith.constant 0 : i32
    %c0_i32_0 = arith.constant 0 : i32
    %c0_i32_1 = arith.constant 0 : i32
    return %c0_i32, %c0_i32_0 : i32, i32
  }
  func.func @transform_2(%arg0: i32) -> (i32, i32) {
    %c0_i32 = arith.constant 0 : i32
    %c0_i32_0 = arith.constant 0 : i32
    return %arg0, %c0_i32 : i32, i32
  }
  func.func @transform_3(%arg0: i32) -> (i32, i32) {
    %c0_i32 = arith.constant 0 : i32
    %c0_i32_0 = arith.constant 0 : i32
    return %arg0, %c0_i32 : i32, i32
  }
  func.func @transform_4(%arg0: i32) -> (i32, i32) {
    %c0_i32 = arith.constant 0 : i32
    %c0_i32_0 = arith.constant 0 : i32
    return %arg0, %c0_i32 : i32, i32
  }
  func.func @transform_5(%arg0: i32) -> (i32, i32) {
    %c0_i32 = arith.constant 0 : i32
    %c0_i32_0 = arith.constant 0 : i32
    return %arg0, %c0_i32 : i32, i32
  }
}

</mosaic_0001>

<bundles_post_ra>
// kernel: tpu_custom_call.1
= control target key start
LH: loop header
LB: loop body
LE: loop exit
PB: predicated region body
PF: predicated region fallthrough
CT: control target
= control target key end

     0   :  { %s4032_s18 = smov 0   ;;  %s4778_s0 = inlined_call_operand.vmem [shape: f32[128,32], index: 0, kind: input, shape index: {}]   ;;  %s4779_s1 = inlined_call_operand.vmem [shape: f32[792,32], index: 1, kind: input, shape index: {}]   ;;  %s4780_s2 = inlined_call_operand.vmem [shape: f32[128,2], index: 2, kind: output, shape index: {0}]   ;;  %s4781_s3 = inlined_call_operand.vmem [shape: f32[128,32], index: 3, kind: output, shape index: {1}]   ;;  %s4782_s4 = inlined_call_operand.vmem [shape: f32[128,4], index: 4, kind: output, shape index: {2}]   ;;  %s4783_s5 = inlined_call_operand.vmem [shape: f32[128,4], index: 5, kind: output, shape index: {3}]  }
   0x1 LB: > { %s3226_s19 = sadd.s32 4294967295, %s3982_s18   ;;  %p3230_p0 = scmp.ge.s32.totalorder %s3982_s18, 1  ;;  %s3982_s18 = sphi %s4032_s18, %s16_s18  }
   0x2   : > { %p195_p1 = scmp.lt.s32.totalorder %s3982_s18, 9 }
   0x4   : > { %p196_p2 = pnand %p3230_p0, %p195_p1 }
   0x5   : > { %v288_v0 = vld [vmem:[%s4779_s1] sm:$0xff] (!%p196_p2)  ;;  %v289_v1 = vld [vmem:[%s4779_s1 + $0x8] sm:$0xff] (!%p196_p2)  ;;  %v290_v2 = vld [vmem:[%s4779_s1 + $0x10] sm:$0xff] (!%p196_p2)  ;;  %s3231_s26 = sshll.u32 (!%p196_p2), %s3226_s19, 1  ;;  %vm297_vm0 = vcmask (!%p196_p2), 261120   ;;  %vm388_vm1 = vcmask (!%p196_p2), 130048  }
   0x6   : > { %199 = sbr.rel (%p196_p2) target bundleno = 6309 (0x18a5), region = 28  ;;  %v3743_v3 = vpack.c.bf16 (!%p196_p2), %v289_v1, %v288_v0  ;;  %v291_v4 = vld [vmem:[%s4779_s1 + $0x18] sm:$0xff] (!%p196_p2)  ;;  %p239_p3 = scmp.lt.s32.totalorder (!%p196_p2), %s3231_s26, 15  ;;  %v381_v8 = vld [vmem:[%s4779_s1 + $0x28] sm:$0xff] (!%p196_p2)  ;;  %v382_v9 = vld [vmem:[%s4779_s1 + $0x30] sm:$0xff] (!%p196_p2)  ;;  %vm478_vm2 = vcmask (!%p196_p2), 64512  }
   0x7   : > { %v3747_v5 = vpack.c.bf16 (!%p196_p2), %v291_v4, %v290_v2  ;;  %v3751_v10 = vpack.c.bf16 (!%p196_p2), %v382_v9, %v381_v8  ;;  %v3241_v11 = vld [vmem:[%s4779_s1 + $0x20] ss:$0 sm:$0xff] (!%p196_p2)  ;;  %v3244_v19 = vld [vmem:[%s4779_s1 + $0x38] ss:$0 sm:$0xff] (!%p196_p2)  ;;  %v562_v26 = vld [vmem:[%s4779_s1 + $0x50] sm:$0xf] (!%p196_p2) }
   0x8   : > { %3744 = vmatprep.subr.bf16.mxu0 (!%p196_p2), %v3743_v3  ;;  %v472_v18 = vld [vmem:[%s4779_s1 + $0x40] sm:$0xff] (!%p196_p2)  ;;  %vm575_vm3 = vcmask (!%p196_p2), 1043456   ;;  %v3247_v27 = vld [vmem:[%s4779_s1 + $0x48] ss:$0 sm:$0xff] (!%p196_p2)  ;;  %vm568_vm4 = vcmask (!%p196_p2), 31744   ;;  %vm667_vm5 = vcmask (!%p196_p2), 1041408  }
   0x9   : > { %3746 = vmatpush3.bf16.msra.mxu0 (!%p196_p2), %v3743_v3  ;;  %3752 = vmatprep.subr.bf16.mxu1 (!%p196_p2), %v3751_v10  ;;  %v654_v34 = vld [vmem:[%s4779_s1 + $0x60] sm:$0x3] (!%p196_p2)  ;;  %v3250_v35 = vld [vmem:[%s4779_s1 + $0x58] ss:$0 sm:$0xff] (!%p196_p2)  ;;  %vm660_vm6 = vcmask (!%p196_p2), 15360   ;;  %s3984_s11 = smov (!%p196_p2), 4  }
   0xa   : > { %3748 = vmatprep.subr.bf16.mxu0 (!%p196_p2), %v3747_v5  ;;  %3754 = vmatpush3.bf16.msra.mxu1 (!%p196_p2), %v3751_v10  ;;  %v3254_v40 = vld [vmem:[%s4779_s1 + $0x68] ss:$0 sm:$0xff] (!%p196_p2)  ;;  %v758_v44 = vld [vmem:[%s4779_s1 + $0x100] sm:$0xff] (!%p196_p2)  ;;  %v4158_v52 = vld [vmem:[%s4779_s1 + $0x70] sm:$0xff] (!%p196_p2)  ;;  %s3985_s6 = smov (!%p196_p2), 8   ;;  %s3986_s13 = smov (!%p196_p2), 12  }
   0xb   : > { %3525 = vmatprep.subr.mxu1 (!%p196_p2), %v472_v18  ;;  %v3258_v53 = vld [vmem:[%s4779_s1 + $0x108] ss:$0 sm:$0xff] (!%p196_p2)  ;;  %v4168_v63 = vld [vmem:[%s4779_s1 + $0x78] sm:$0xff] (!%p196_p2)  ;;  %v4173_v0 = vld [vmem:[%s4779_s1 + $0x80] sm:$0xff] (!%p196_p2)  ;;  %s3987_s19 = smov (!%p196_p2), 16   ;;  %s3988_s20 = smov (!%p196_p2), 20  }
   0xc   : > { %v4182_v1 = vld [vmem:[%s4779_s1 + $0x88] sm:$0xff] (!%p196_p2)  ;;  %v4187_v2 = vld [vmem:[%s4779_s1 + $0x90] sm:$0xff] (!%p196_p2)  ;;  %v4196_v3 = vld [vmem:[%s4779_s1 + $0x98] sm:$0xff] (!%p196_p2)  ;;  %s3989_s23 = smov (!%p196_p2), 24   ;;  %s3990_s24 = smov (!%p196_p2), 28   ;;  %vm1128_vm9 = vcmask (!%p196_p2), 97280  }
   0xd   : > { %s4787_s26 = smov (!%p239_p3, %s3231_s26), 15  ;;  %3750 = vmatpush3.bf16.msra.mxu0 %v3747_v5  ;;  %v4201_v4 = vld [vmem:[%s4779_s1 + $0xa0] sm:$0xff]  ;;  %v4210_v5 = vld [vmem:[%s4779_s1 + $0xa8] sm:$0xff]  ;;  %v4243_v10 = vld [vmem:[%s4779_s1 + $0xd0] sm:$0xff]  ;;  %s3991_s25 = smov 32   ;;  %vm1133_vm10 = vcmask 162816  }
   0xe   : > { %s4052_s29 = sshll.u32 %s4787_s26, 3  ;;  %3530 = vmatprep.subr.msk.mxu0 %vm575_vm3, %v562_v26  ;;  %v4229_v8 = vld [vmem:[%s4779_s1 + $0xc0] sm:$0xff]  ;;  %v4238_v9 = vld [vmem:[%s4779_s1 + $0xc8] sm:$0xff]  ;;  %vm1136_vm11 = vcmask 195584   ;;  %vm1139_vm12 = vcmask 228352   ;;  %vm1154_vm13 = vcmask 293888  }
   0xf   : > { %s4058_s7 = scalar_lea.vmem %s4778_s0, %s4052_s29  ;;  %s248_s30 = scalar_lea.vmem %s4780_s2, %s4052_s29  ;;  %vm3993_vm14 = vmmov 0  }
  0x10   : > { %v268_v6 = vld [vmem:[%s4058_s7] sm:$0xff]  ;;  %v269_v7 = vld [vmem:[%s4058_s7 + $0x8] sm:$0xff]  ;;  %s3994_s22 = smov 40   ;;  %s3997_s26 = smov 64  }
  0x11   : > { %3515 = vmatprep.mubr.msk.f32.mxu0 %vm297_vm0, %v268_v6  ;;  %v4215_v6 = vld [vmem:[%s4779_s1 + $0xb0] sm:$0xff]  ;;  %s4001_s8 = smov 112   ;;  %s266_s21 = scalar_lea.vmem %s4783_s5, %s4052_s29 }
  0x12   : > { %3516 = vmatmul.mubr.msk.f32.vlgmr.msra.gmra.mrb[0].mxu0 %vm297_vm0, %v269_v7  ;;  %v4224_v7 = vld [vmem:[%s4779_s1 + $0xb8] sm:$0xff] }
  0x13   : > { %3531 = vmatpush3.msk.msra.mxu0 %vm575_vm3, %v562_v26 }
  0x14   : > { %3540 = vmatprep.subr.mxu0 %v758_v44 }
  0xe5   : > { %v3517_v12 = vpop.f32.mrb[0].mxu0 }
  0xe6   : > { %v376_v13 = vadd.f32 %v3517_v12, %v3241_v11  ;;  %v370_v14 = vpop.f32.mrb[1].mxu0  ;;  %v4257_v12 = vld [vmem:[%s4779_s1 + $0xe0] sm:$0xff] }
  0xe7   : > { %v371_v15 = vadd.f32 %v3241_v11, %v370_v14  ;;  %v4252_v11 = vld [vmem:[%s4779_s1 + $0xd8] sm:$0xff]  ;;  %v4271_v14 = vld [vmem:[%s4779_s1 + $0xf0] sm:$0xff] }
  0xe9   : > { %3898 = vtanh.f32 %v371_v15  ;;  %v4280_v15 = vld [vmem:[%s4779_s1 + $0xf8] sm:$0xff] }
  0xea   : > { %3900 = vtanh.f32 %v376_v13  ;;  %v4266_v13 = vld [vmem:[%s4779_s1 + $0xe8] sm:$0xff] }
  0xf3   : > { %v4073_v16 = vpop.eup %3898 }
  0xf4   : > { %v4075_v17 = vpop.eup %3900  ;;  %3522 = vmatprep.mubr.msk.f32.mxu1 %vm388_vm1, %v4073_v16 }
  0xf5   : > { %3523 = vmatmul.mubr.msk.f32.vlgmr.msra.gmra.mrb[0].mxu1 %vm388_vm1, %v4075_v17 }
  0xf6   : > { %3526 = vmatpush3.msra.mxu1 %v472_v18 }
  0xf7   : > { %3535 = vmatprep.subr.msk.mxu1 %vm667_vm5, %v654_v34 }
 0x1c8   : > { %v3524_v20 = vpop.f32.mrb[0].mxu1 }
 0x1c9   : > { %v467_v21 = vadd.f32 %v3524_v20, %v3244_v19  ;;  %v461_v22 = vpop.f32.mrb[1].mxu1 }
 0x1ca   : > { %v462_v23 = vadd.f32 %v3244_v19, %v461_v22 }
 0x1cc   : > { %3902 = vtanh.f32 %v462_v23 }
 0x1cd   : > { %3904 = vtanh.f32 %v467_v21 }
 0x1d6   : > { %v4087_v24 = vpop.eup %3902 }
 0x1d7   : > { %v4089_v25 = vpop.eup %3904  ;;  %3527 = vmatprep.mubr.msk.f32.mxu1 %vm478_vm2, %v4087_v24 }
 0x1d8   : > { %3528 = vmatmul.mubr.msk.f32.vlgmr.msra.gmra.mrb[2].mxu1 %vm478_vm2, %v4089_v25 }
 0x1d9   : > { %3536 = vmatpush3.msk.msra.mxu1 %vm667_vm5, %v654_v34  ;;  %v1146_v34 = vld [vmem:[%s4779_s1 + $0x120] sm:$0xff] }
 0x2ab   : > { %v3529_v28 = vpop.f32.mrb[2].mxu1 }
 0x2ac   : > { %v557_v29 = vadd.f32 %v3529_v28, %v3247_v27  ;;  %v551_v30 = vpop.f32.mrb[3].mxu1  ;;  %v1145_v28 = vld [vmem:[%s4779_s1 + $0x118] sm:$0xff] }
 0x2ad   : > { %v552_v31 = vadd.f32 %v3247_v27, %v551_v30  ;;  %v1144_v27 = vld [vmem:[%s4779_s1 + $0x110] sm:$0xff] }
 0x2ae   : > { %v3759_v30 = vpack.c.bf16 %v1145_v28, %v1144_v27 }
 0x2af   : > { %3906 = vtanh.f32 %v552_v31 }
 0x2b0   : > { %3908 = vtanh.f32 %v557_v29 }
 0x2b9   : > { %v4103_v32 = vpop.eup %3906 }
 0x2ba   : > { %v4105_v33 = vpop.eup %3908  ;;  %3532 = vmatprep.mubr.msk.f32.mxu0 %vm568_vm4, %v4103_v32 }
 0x2bb   : > { %3533 = vmatmul.mubr.msk.f32.vlgmr.msra.gmra.mrb[2].mxu0 %vm568_vm4, %v4105_v33 }
 0x2bc   : > { %3541 = vmatpush3.msra.mxu0 %v758_v44 }
 0x2bd   : > { %3760 = vmatprep.subr.bf16.mxu0 %v3759_v30 }
 0x38e   : > { %v3534_v36 = vpop.f32.mrb[2].mxu0 }
 0x38f   : > { %v4123_v37 = vadd.f32 %v3534_v36, %v3250_v35  ;;  %v645_v38 = vpop.f32.mrb[3].mxu0 }
 0x390   : > { %v4125_v39 = vadd.f32 %v3250_v35, %v645_v38  ;;  %v1147_v35 = vld [vmem:[%s4779_s1 + $0x128] sm:$0xff] }
 0x391   : > { %3056 = vst.msk [vmem:[%s248_s30 + $0x8] sm:$0xff] %vm660_vm6, %v4123_v37  ;;  %v3763_v38 = vpack.c.bf16 %v1147_v35, %v1146_v34 }
 0x392   : > { %3055 = vst.msk [vmem:[%s248_s30] sm:$0xff] %vm660_vm6, %v4125_v39  ;;  %3537 = vmatprep.mubr.msk.f32.mxu1 %vm660_vm6, %v4125_v39 }
 0x393   : > { %3538 = vmatmul.mubr.msk.f32.vlgmr.msra.gmra.mrb[4].mxu1 %vm660_vm6, %v4123_v37 }
 0x394   : > { %3549 = vmatprep.mubr.msk.f32.mxu1 %vm388_vm1, %v4158_v52 }
 0x466   : > { %v3539_v41 = vpop.f32.mrb[4].mxu1 }
 0x467   : > { %v737_v42 = vpop.f32.mrb[5].mxu1  ;;  %v743_v45 = vadd.f32 %v3539_v41, %v3254_v40 }
 0x468   : > { %v738_v43 = vadd.f32 %v3254_v40, %v737_v42  ;;  %v1148_v42 = vld [vmem:[%s4779_s1 + $0x130] sm:$0xf] }
 0x46a   : > { %3910 = vtanh.f32 %v738_v43 }
 0x46b   : > { %3912 = vtanh.f32 %v743_v45 }
 0x474   : > { %v4141_v46 = vpop.eup %3910 }
 0x475   : > { %750 = vrot.lane.b32.xlu0 %v4141_v46, %s3984_s11  ;;  %v4145_v47 = vpop.eup %3912 }
 0x479   : > { %752 = vrot.lane.b32.xlu0 %v4145_v47, %s3984_s11 }
 0x4e7   : > { %v751_v48 = vpop.permute.xlu0 %750 }
 0x4e8   : > { %v756_v49 = vsel %vm568_vm4, %v4103_v32, %v751_v48 }
 0x4e9   : > { %3542 = vmatprep.mubr.msk.f32.mxu0 %vm478_vm2, %v756_v49 }
 0x4eb   : > { %v753_v50 = vpop.permute.xlu0 %752 }
 0x4ec   : > { %v757_v51 = vsel %vm568_vm4, %v4105_v33, %v753_v50 }
 0x4ed   : > { %3543 = vmatmul.mubr.msk.f32.vlgmr.msra.gmra.mrb[4].mxu0 %vm478_vm2, %v757_v51 }
 0x4ee   : > { %3762 = vmatpush3.bf16.msra.mxu0 %v3759_v30 }
 0x4ef   : > { %3764 = vmatprep.subr.bf16.mxu0 %v3763_v38 }
 0x4f2   : > { %3766 = vmatpush3.bf16.msra.mxu0 %v3763_v38 }
 0x4f3   : > { %3584 = vmatprep.subr.msk.mxu0 %vm575_vm3, %v1148_v42 }
 0x4f6   : > { %3585 = vmatpush3.msk.msra.mxu0 %vm575_vm3, %v1148_v42 }
 0x5c0   : > { %v3544_v54 = vpop.f32.mrb[4].mxu0 }
 0x5c1   : > { %v842_v55 = vadd.f32 %v3544_v54, %v3258_v53  ;;  %v836_v56 = vpop.f32.mrb[5].mxu0 }
 0x5c2   : > { %v837_v57 = vadd.f32 %v3258_v53, %v836_v56 }
 0x5c3   : > { %vm846_vm7 = vcmp.gt.f32.partialorder %v842_v55, 0.0  ;;  %v848_v58 = vmul.f32 0.01, %v842_v55 }
 0x5c4   : > { %vm845_vm8 = vcmp.gt.f32.partialorder %v837_v57, 0.0  ;;  %v847_v59 = vmul.f32 0.01, %v837_v57 }
 0x5c5   : > { %v850_v60 = vsel %vm846_vm7, %v842_v55, %v848_v58 }
 0x5c6   : > { %v849_v61 = vsel %vm845_vm8, %v837_v57, %v847_v59  ;;  %vm1778_vm8 = vcmask 326656  }
 0x5c7   : > { %v3755_v62 = vpack.c.bf16 %v850_v60, %v849_v61 }
 0x5c9   : > { %3756 = vmatprep.subr.bf16.mxu1 %v3755_v62 }
 0x5ca   : > { %3758 = vmatpush3.bf16.msra.mxu1 %v3755_v62 }
 0x5cd   : > { %3550 = vmatmul.mubr.msk.f32.vlgmr.msra.gmra.mrb[6].mxu1 %vm388_vm1, %v4168_v63 }
 0x5ce   : > { %3552 = vmatprep.mubr.msk.f32.mxu1 %vm388_vm1, %v4173_v0 }
 0x5d1   : > { %3553 = vmatmul.mubr.msk.f32.gmra.mrb[8].mxu1 %vm388_vm1, %v4182_v1 }
 0x5d2   : > { %3555 = vmatprep.mubr.msk.f32.mxu1 %vm388_vm1, %v4187_v2 }
 0x5d5   : > { %3556 = vmatmul.mubr.msk.f32.gmra.mrb[10].mxu1 %vm388_vm1, %v4196_v3 }
 0x5d6   : > { %3558 = vmatprep.mubr.msk.f32.mxu1 %vm388_vm1, %v4201_v4 }
 0x5d9   : > { %3559 = vmatmul.mubr.msk.f32.gmra.mrb[12].mxu1 %vm388_vm1, %v4210_v5 }
 0x5da   : > { %3561 = vmatprep.mubr.msk.f32.mxu1 %vm388_vm1, %v4215_v6 }
 0x5dd   : > { %3562 = vmatmul.mubr.msk.f32.gmra.mrb[14].mxu1 %vm388_vm1, %v4224_v7 }
 0x5de   : > { %3564 = vmatprep.mubr.msk.f32.mxu1 %vm388_vm1, %v4229_v8 }
 0x5e1   : > { %3565 = vmatmul.mubr.msk.f32.gmra.mrb[16].mxu1 %vm388_vm1, %v4238_v9 }
 0x5e2   : > { %3567 = vmatprep.mubr.msk.f32.mxu1 %vm388_vm1, %v4243_v10 }
 0x5e5   : > { %3568 = vmatmul.mubr.msk.f32.gmra.mrb[18].mxu1 %vm388_vm1, %v4252_v11 }
 0x5e6   : > { %3570 = vmatprep.mubr.msk.f32.mxu1 %vm388_vm1, %v4257_v12 }
 0x5e9   : > { %3571 = vmatmul.mubr.msk.f32.gmra.mrb[20].mxu1 %vm388_vm1, %v4266_v13 }
 0x5ea   : > { %3573 = vmatprep.mubr.msk.f32.mxu1 %vm388_vm1, %v4271_v14 }
 0x5ed   : > { %3574 = vmatmul.mubr.msk.f32.gmra.mrb[22].mxu1 %vm388_vm1, %v4280_v15 }
 0x6a0   : > { %v4284_v18 = vpop.f32.mrb[6].mxu1 }
 0x6a1   : > { %v4286_v19 = vpop.f32.mrb[7].mxu1 }
 0x6a4   : > { %v3554_v20 = vpop.f32.mrb[8].mxu1 }
 0x6a5   : > { %1064 = vrot.lane.b32.xlu1 %v3554_v20, %s3984_s11  ;;  %v981_v21 = vpop.f32.mrb[9].mxu1 }
 0x6a8   : > { %v3557_v22 = vpop.f32.mrb[10].mxu1 }
 0x6a9   : > { %1062 = vrot.lane.b32.xlu1 %v981_v21, %s3984_s11  ;;  %v991_v23 = vpop.f32.mrb[11].mxu1 }
 0x6aa   : > { %1070 = vrot.lane.b32.xlu0 %v991_v23, %s3985_s6 }
 0x6ac   : > { %v3560_v26 = vpop.f32.mrb[12].mxu1 }
 0x6ad   : > { %1072 = vrot.lane.b32.xlu1 %v3557_v22, %s3985_s6  ;;  %v1001_v29 = vpop.f32.mrb[13].mxu1 }
 0x6ae   : > { %1078 = vrot.lane.b32.xlu0 %v1001_v29, %s3986_s13 }
 0x6b0   : > { %v3563_v31 = vpop.f32.mrb[14].mxu1 }
 0x6b1   : > { %1080 = vrot.lane.b32.xlu1 %v3560_v26, %s3986_s13  ;;  %v1011_v36 = vpop.f32.mrb[15].mxu1 }
 0x6b2   : > { %1086 = vrot.lane.b32.xlu0 %v1011_v36, %s3987_s19 }
 0x6b4   : > { %v3566_v40 = vpop.f32.mrb[16].mxu1 }
 0x6b5   : > { %1088 = vrot.lane.b32.xlu1 %v3563_v31, %s3987_s19  ;;  %v1021_v41 = vpop.f32.mrb[17].mxu1 }
 0x6b6   : > { %1094 = vrot.lane.b32.xlu0 %v1021_v41, %s3988_s20 }
 0x6b8   : > { %v3569_v43 = vpop.f32.mrb[18].mxu1 }
 0x6b9   : > { %1096 = vrot.lane.b32.xlu1 %v3566_v40, %s3988_s20  ;;  %v1031_v44 = vpop.f32.mrb[19].mxu1 }
 0x6ba   : > { %1102 = vrot.lane.b32.xlu0 %v1031_v44, %s3989_s23 }
 0x6bc   : > { %v3572_v45 = vpop.f32.mrb[20].mxu1 }
 0x6bd   : > { %1104 = vrot.lane.b32.xlu1 %v3569_v43, %s3989_s23  ;;  %v1041_v48 = vpop.f32.mrb[21].mxu1 }
 0x6be   : > { %1110 = vrot.lane.b32.xlu0 %v1041_v48, %s3990_s24 }
 0x6c0   : > { %v3575_v49 = vpop.f32.mrb[22].mxu1 }
 0x6c1   : > { %1112 = vrot.lane.b32.xlu1 %v3572_v45, %s3990_s24  ;;  %v1051_v50 = vpop.f32.mrb[23].mxu1  ;;  %v3279_v45 = vld [vmem:[%s4779_s1 + $0x138] ss:$0 sm:$0xff]  ;;  %s3996_s24 = smov 56  }
 0x6c2   : > { %1118 = vrot.lane.b32.xlu0 %v1051_v50, %s3991_s25 }
 0x6c5   : > { %1120 = vrot.lane.b32.xlu1 %v3575_v49, %s3991_s25 }
 0x717   : > { %v1065_v51 = vpop.permute.xlu1 %1064 }
 0x718   : > { %v1125_v27 = vsel %vm568_vm4, %v4284_v18, %v1065_v51 }
 0x71b   : > { %v1063_v53 = vpop.permute.xlu1 %1062 }
 0x71c   : > { %v1071_v54 = vpop.permute.xlu0 %1070  ;;  %v1124_v62 = vsel %vm568_vm4, %v4286_v19, %v1063_v53 }
 0x71d   : > { %v1126_v21 = vsel %vm478_vm2, %v1124_v62, %v1071_v54 }
 0x71f   : > { %v1073_v55 = vpop.permute.xlu1 %1072 }
 0x720   : > { %v1079_v56 = vpop.permute.xlu0 %1078  ;;  %v1127_v29 = vsel %vm478_vm2, %v1125_v27, %v1073_v55 }
 0x721   : > { %v1129_v23 = vsel %vm1128_vm9, %v1126_v21, %v1079_v56  ;;  %v3992_v21 = vmov 0.0  }
 0x722   : > { %3589 = vmatprep.subr.mxu0 %v3992_v21 }
 0x723   : > { %v1081_v57 = vpop.permute.xlu1 %1080 }
 0x724   : > { %v1087_v58 = vpop.permute.xlu0 %1086  ;;  %v1130_v30 = vsel %vm1128_vm9, %v1127_v29, %v1081_v57 }
 0x725   : > { %v1131_v28 = vsel %vm388_vm1, %v1129_v23, %v1087_v58 }
 0x727   : > { %v1089_v59 = vpop.permute.xlu1 %1088 }
 0x728   : > { %v1095_v60 = vpop.permute.xlu0 %1094  ;;  %v1132_v35 = vsel %vm388_vm1, %v1130_v30, %v1089_v59 }
 0x729   : > { %v1134_v19 = vsel %vm1133_vm10, %v1131_v28, %v1095_v60 }
 0x72b   : > { %v1097_v61 = vpop.permute.xlu1 %1096 }
 0x72c   : > { %v1103_v20 = vpop.permute.xlu0 %1102  ;;  %v1135_v40 = vsel %vm1133_vm10, %v1132_v35, %v1097_v61  ;;  %vm1784_vm10 = vcmask 457728  }
 0x72d   : > { %v1137_v31 = vsel %vm1136_vm11, %v1134_v19, %v1103_v20 }
 0x72f   : > { %v1105_v22 = vpop.permute.xlu1 %1104 }
 0x730   : > { %v1111_v26 = vpop.permute.xlu0 %1110  ;;  %v1138_v41 = vsel %vm1136_vm11, %v1135_v40, %v1105_v22 }
 0x731   : > { %v1140_v36 = vsel %vm1139_vm12, %v1137_v31, %v1111_v26 }
 0x733   : > { %v1113_v34 = vpop.permute.xlu1 %1112 }
 0x734   : > { %v1119_v38 = vpop.permute.xlu0 %1118  ;;  %v1141_v42 = vsel %vm1139_vm12, %v1138_v41, %v1113_v34  ;;  %v1354_v41 = vld [vmem:[%s4779_s1 + $0x148] sm:$0xff]  ;;  %vm1787_vm12 = vcmask 523264  }
 0x735   : > { %v1142_v18 = vsel %vm297_vm0, %v1140_v36, %v1119_v38  ;;  %v1353_v38 = vld [vmem:[%s4779_s1 + $0x140] sm:$0xff] }
 0x736   : > { %3586 = vmatprep.mubr.msk.f32.mxu0 %vm1154_vm13, %v1142_v18 }
 0x737   : > { %v1121_v43 = vpop.permute.xlu1 %1120 }
 0x738   : > { %v1143_v44 = vsel %vm297_vm0, %v1141_v42, %v1121_v43  ;;  %v1457_v42 = vld [vmem:[%s4779_s1 + $0x160] sm:$0xff]  ;;  %v1458_v43 = vld [vmem:[%s4779_s1 + $0x168] sm:$0xff] }
 0x739   : > { %3587 = vmatmul.mubr.msk.f32.vlgmr.msra.gmra.mrb[6].mxu0 %vm1154_vm13, %v1143_v44  ;;  %v3767_v44 = vpack.c.bf16 %v1458_v43, %v1457_v42  ;;  %v1796_v43 = vld [vmem:[%s4779_s1 + $0x1a8] sm:$0xff]  ;;  %vm1804_vm13 = vcmask 588800  }
 0x73a   : > { %3591 = vmatprep.mubr.msk.f32.mxu0 %vm3993_vm14, %v3992_v21 }
 0x80c   : > { %v3588_v48 = vpop.f32.mrb[6].mxu0 }
 0x80d   : > { %v1236_v49 = vadd.f32 %v3588_v48, %v3279_v45  ;;  %v1230_v50 = vpop.f32.mrb[7].mxu0 }
 0x80e   : > { %v1231_v51 = vadd.f32 %v3279_v45, %v1230_v50  ;;  %v3288_v45 = vld [vmem:[%s4779_s1 + $0x158] ss:$0 sm:$0xff] }
 0x80f   : > { %v1240_v53 = vsub.f32 0.0, %v1236_v49 }
 0x810   : > { %v1239_v54 = vsub.f32 0.0, %v1231_v51 }
 0x811   : > { %v1243_v55 = vmul.f32 1.442695, %v1240_v53 }
 0x812   : > { %v1241_v56 = vmul.f32 1.442695, %v1239_v54 }
 0x813   : > { %3914 = vpow2.f32 %v1243_v55 }
 0x814   : > { %3916 = vpow2.f32 %v1241_v56 }
 0x81d   : > { %v3915_v57 = vpop.eup %3914 }
 0x81e   : > { %v3917_v58 = vpop.eup %3916  ;;  %v1246_v59 = vadd.f32 1.0, %v3915_v57 }
 0x81f   : > { %v1245_v60 = vadd.f32 1.0, %v3917_v58 }
 0x820   : > { %3918 = vrcp.f32 %v1246_v59  ;;  %v3289_v59 = vld [vmem:[%s4779_s1 + $0x170] ss:$0 sm:$0xff] }
 0x821   : > { %3920 = vrcp.f32 %v1245_v60 }
 0x82a   : > { %v3919_v61 = vpop.eup %3918 }
 0x82b   : > { %v3921_v62 = vpop.eup %3920  ;;  %v1252_v20 = vsub.f32 1.0, %v3919_v61  ;;  %v1256_v26 = vmul.f32 %v3919_v61, %v4145_v47 }
 0x82c   : > { %v1251_v22 = vsub.f32 1.0, %v3921_v62  ;;  %v1255_v28 = vmul.f32 %v3921_v62, %v4141_v46 }
 0x82d   : > { %v1254_v23 = vmul.f32 %v4105_v33, %v1252_v20 }
 0x82e   : > { %v1253_v27 = vmul.f32 %v4103_v32, %v1251_v22  ;;  %v1275_v32 = vld [vmem:[%s4779_s1 + $0x150] sm:$0xff] }
 0x82f   : > { %v1258_v29 = vadd.f32 %v1256_v26, %v1254_v23 }
 0x830   : > { %v1257_v19 = vadd.f32 %v1255_v28, %v1253_v27  ;;  %v1790_v28 = vld [vmem:[%s4779_s1 + $0x178] sm:$0xff] }
 0x831   : > { %1265 = vrot.lane.b32.xlu1 %v1258_v29, %s3985_s6  ;;  %v1268_v31 = vrot.slane %v1258_v29, 4  ;;  %v1791_v29 = vld [vmem:[%s4779_s1 + $0x180] sm:$0xff] }
 0x832   : > { %v1260_v30 = vrot.slane %v1257_v19, 4 }
 0x834   : > { %1261 = vrot.lane.b32.xlu0 %v1260_v30, %s3984_s11  ;;  %v1792_v30 = vld [vmem:[%s4779_s1 + $0x188] sm:$0xff]  ;;  %s4000_s11 = smov 96  }
 0x838   : > { %1269 = vrot.lane.b32.xlu0 %v1268_v31, %s3986_s13  ;;  %v1793_v31 = vld [vmem:[%s4779_s1 + $0x190] sm:$0xff]  ;;  %s260_s13 = scalar_lea.vmem %s4782_s4, %s4052_s29 }
 0x8a3   : > { %v1266_v33 = vpop.permute.xlu1 %1265 }
 0x8a6   : > { %v1262_v34 = vpop.permute.xlu0 %1261 }
 0x8a7   : > { %v1272_v35 = vsel %vm568_vm4, %v1257_v19, %v1262_v34  ;;  %v3775_v19 = vpack.c.bf16 %v1791_v29, %v1790_v28  ;;  %v3779_v34 = vpack.c.bf16 %v1793_v31, %v1792_v30 }
 0x8a8   : > { %v1273_v47 = vsel %vm478_vm2, %v1272_v35, %v1266_v33 }
 0x8a9   : > { %3776 = vmatprep.subr.bf16.mxu1 %v3775_v19 }
 0x8aa   : > { %v1270_v36 = vpop.permute.xlu0 %1269  ;;  %3778 = vmatpush3.bf16.msra.mxu1 %v3775_v19 }
 0x8ab   : > { %v1274_v46 = vsel %vm1128_vm9, %v1273_v47, %v1270_v36  ;;  %3780 = vmatprep.subr.bf16.mxu1 %v3779_v34  ;;  %vm1781_vm9 = vcmask 392192  }
 0x8ac   : > { %3590 = vmatpush3.msk.msra.mxu0 %vm575_vm3, %v1274_v46  ;;  %v1795_v46 = vld [vmem:[%s4779_s1 + $0x1a0] sm:$0xff] }
 0x8ad   : > { %3592 = vmatmul.mubr.msk.f32.vlgmr.msra.gmra.mrb[8].mxu0 %vm568_vm4, %v1275_v32  ;;  %v1794_v32 = vld [vmem:[%s4779_s1 + $0x198] sm:$0xff] }
 0x8ae   : > { %3596 = vmatprep.mubr.msk.f32.mxu0 %vm388_vm1, %v1353_v38  ;;  %3782 = vmatpush3.bf16.msra.mxu1 %v3779_v34  ;;  %v3783_v38 = vpack.c.bf16 %v1795_v46, %v1794_v32 }
 0x8b0   : > { %3784 = vmatprep.subr.bf16.mxu1 %v3783_v38 }
 0x8b2   : > { %3786 = vmatpush3.bf16.msra.mxu1 %v3783_v38 }
 0x980   : > { %v1348_v40 = vpop.f32.mrb[8].mxu0 }
 0x981   : > { %v3593_v18 = vpop.f32.mrb[9].mxu0  ;;  %3594 = vmatprep.subr.msk.mxu0 %vm388_vm1, %v1348_v40 }
 0x982   : > { %3595 = vmatpush3.xpose.msk.msra.mxu0 %vm388_vm1, %v1348_v40 }
 0x983   : > { %3768 = vmatprep.subr.bf16.mxu0 %v3767_v44 }
 0x985   : > { %3597 = vmatmul.mubr.msk.f32.vlgmr.msra.gmra.mrb[10].mxu0 %vm388_vm1, %v1354_v41 }
 0x986   : > { %3770 = vmatpush3.bf16.msra.mxu0 %v3767_v44  ;;  %v1797_v44 = vld [vmem:[%s4779_s1 + $0x1b0] sm:$0xff] }
 0xa58   : > { %v3598_v48 = vpop.f32.mrb[10].mxu0 }
 0xa59   : > { %v1444_v49 = vadd.f32 %v3598_v48, %v3288_v45  ;;  %v1430_v50 = vpop.f32.mrb[11].mxu0 }
 0xa5a   : > { %v1443_v51 = vadd.f32 %v3288_v45, %v1430_v50  ;;  %v3787_v45 = vpack.c.bf16 %v1797_v44, %v1796_v43 }
 0xa5b   : > { %3922 = vtanh.f32 %v1444_v49 }
 0xa5c   : > { %3924 = vtanh.f32 %v1443_v51  ;;  %3788 = vmatprep.subr.bf16.mxu1 %v3787_v45  ;;  %v1798_v51 = vld [vmem:[%s4779_s1 + $0x1b8] sm:$0xff] }
 0xa5d   : > { %3790 = vmatpush3.bf16.msra.mxu1 %v3787_v45 }
 0xa5e   : > { %3653 = vmatprep.subr.mxu1 %v1798_v51 }
 0xa61   : > { %3654 = vmatpush3.msra.mxu1 %v1798_v51 }
 0xa65   : > { %v4370_v53 = vpop.eup %3922 }
 0xa66   : > { %v4372_v54 = vpop.eup %3924  ;;  %1451 = vrot.lane.b32.xlu0 %v4370_v53, %s3985_s6 }
 0xa67   : > { %1449 = vrot.lane.b32.xlu1 %v4372_v54, %s3985_s6 }
 0xad8   : > { %v1452_v55 = vpop.permute.xlu0 %1451 }
 0xad9   : > { %v1450_v56 = vpop.permute.xlu1 %1449  ;;  %v1456_v58 = vsel %vm478_vm2, %v4089_v25, %v1452_v55 }
 0xada   : > { %v1455_v57 = vsel %vm478_vm2, %v4087_v24, %v1450_v56 }
 0xadb   : > { %3603 = vmatprep.mubr.msk.f32.mxu0 %vm388_vm1, %v1455_v57 }
 0xadc   : > { %3604 = vmatmul.mubr.msk.f32.vlgmr.msra.gmra.mrb[12].mxu0 %vm388_vm1, %v1456_v58 }
 0xadd   : > { %3610 = vmatprep.mubr.msk.f32.mxu0 %vm388_vm1, %v4158_v52 }
 0xbaf   : > { %v3605_v60 = vpop.f32.mrb[12].mxu0 }
 0xbb0   : > { %v1542_v61 = vadd.f32 %v3605_v60, %v3289_v59  ;;  %v1536_v62 = vpop.f32.mrb[13].mxu0 }
 0xbb1   : > { %v1537_v20 = vadd.f32 %v3289_v59, %v1536_v62 }
 0xbb2   : > { %vm1546_vm15 = vcmp.gt.f32.partialorder %v1542_v61, 0.0  ;;  %v1548_v21 = vmul.f32 0.01, %v1542_v61 }
 0xbb3   : > { %vm1545_vm7 = vcmp.gt.f32.partialorder %v1537_v20, 0.0  ;;  %v1547_v22 = vmul.f32 0.01, %v1537_v20 }
 0xbb4   : > { %v1550_v23 = vsel %vm1546_vm15, %v1542_v61, %v1548_v21  ;;  %vm2417_vm15 = vcmask 654336  }
 0xbb5   : > { %v1549_v26 = vsel %vm1545_vm7, %v1537_v20, %v1547_v22  ;;  %vm2420_vm7 = vcmask 785408  }
 0xbb6   : > { %v3771_v27 = vpack.c.bf16 %v1550_v23, %v1549_v26 }
 0xbb8   : > { %3772 = vmatprep.subr.bf16.mxu0 %v3771_v27 }
 0xbb9   : > { %3774 = vmatpush3.bf16.msra.mxu0 %v3771_v27 }
 0xbbc   : > { %3611 = vmatmul.mubr.msk.f32.vlgmr.msra.gmra.mrb[14].mxu0 %vm388_vm1, %v4168_v63 }
 0xbbd   : > { %3613 = vmatprep.mubr.msk.f32.mxu0 %vm388_vm1, %v4173_v0 }
 0xbc0   : > { %3614 = vmatmul.mubr.msk.f32.gmra.mrb[16].mxu0 %vm388_vm1, %v4182_v1 }
 0xbc1   : > { %3616 = vmatprep.mubr.msk.f32.mxu0 %vm388_vm1, %v4187_v2 }
 0xbc4   : > { %3617 = vmatmul.mubr.msk.f32.gmra.mrb[18].mxu0 %vm388_vm1, %v4196_v3 }
 0xbc5   : > { %3619 = vmatprep.mubr.msk.f32.mxu0 %vm388_vm1, %v4201_v4 }
 0xbc8   : > { %3620 = vmatmul.mubr.msk.f32.gmra.mrb[20].mxu0 %vm388_vm1, %v4210_v5 }
 0xbc9   : > { %3622 = vmatprep.mubr.msk.f32.mxu0 %vm388_vm1, %v4215_v6 }
 0xbcc   : > { %3623 = vmatmul.mubr.msk.f32.gmra.mrb[22].mxu0 %vm388_vm1, %v4224_v7 }
 0xbcd   : > { %3625 = vmatprep.mubr.msk.f32.mxu0 %vm388_vm1, %v4229_v8 }
 0xbd0   : > { %3626 = vmatmul.mubr.msk.f32.gmra.mrb[24].mxu0 %vm388_vm1, %v4238_v9 }
 0xbd1   : > { %3628 = vmatprep.mubr.msk.f32.mxu0 %vm388_vm1, %v4243_v10 }
 0xbd4   : > { %3629 = vmatmul.mubr.msk.f32.gmra.mrb[26].mxu0 %vm388_vm1, %v4252_v11 }
 0xbd5   : > { %3631 = vmatprep.mubr.msk.f32.mxu0 %vm388_vm1, %v4257_v12 }
 0xbd8   : > { %3632 = vmatmul.mubr.msk.f32.gmra.mrb[28].mxu0 %vm388_vm1, %v4266_v13 }
 0xbd9   : > { %3634 = vmatprep.mubr.msk.f32.mxu0 %vm388_vm1, %v4271_v14 }
 0xbdc   : > { %3635 = vmatmul.mubr.msk.f32.gmra.mrb[30].mxu0 %vm388_vm1, %v4280_v15 }
 0xc8f   : > { %v4435_v35 = vpop.f32.mrb[14].mxu0 }
 0xc90   : > { %v4437_v33 = vpop.f32.mrb[15].mxu0 }
 0xc93   : > { %v3615_v47 = vpop.f32.mrb[16].mxu0 }
 0xc94   : > { %1710 = vrot.lane.b32.xlu0 %v3615_v47, %s3985_s6  ;;  %v1627_v36 = vpop.f32.mrb[17].mxu0 }
 0xc95   : > { %1708 = vrot.lane.b32.xlu1 %v1627_v36, %s3985_s6 }
 0xc97   : > { %v3618_v40 = vpop.f32.mrb[18].mxu0 }
 0xc98   : > { %1718 = vrot.lane.b32.xlu0 %v3618_v40, %s3987_s19  ;;  %v1637_v18 = vpop.f32.mrb[19].mxu0 }
 0xc99   : > { %1716 = vrot.lane.b32.xlu1 %v1637_v18, %s3987_s19 }
 0xc9b   : > { %v3621_v41 = vpop.f32.mrb[20].mxu0 }
 0xc9c   : > { %1726 = vrot.lane.b32.xlu0 %v3621_v41, %s3989_s23  ;;  %v1647_v42 = vpop.f32.mrb[21].mxu0 }
 0xc9d   : > { %1724 = vrot.lane.b32.xlu1 %v1647_v42, %s3989_s23  ;;  %s3995_s23 = smov 48  }
 0xc9f   : > { %v3624_v48 = vpop.f32.mrb[22].mxu0 }
 0xca0   : > { %1734 = vrot.lane.b32.xlu0 %v3624_v48, %s3991_s25  ;;  %v1657_v49 = vpop.f32.mrb[23].mxu0 }
 0xca1   : > { %1732 = vrot.lane.b32.xlu1 %v1657_v49, %s3991_s25 }
 0xca3   : > { %v3627_v50 = vpop.f32.mrb[24].mxu0 }
 0xca4   : > { %1742 = vrot.lane.b32.xlu0 %v3627_v50, %s3994_s22  ;;  %v1667_v55 = vpop.f32.mrb[25].mxu0 }
 0xca5   : > { %1740 = vrot.lane.b32.xlu1 %v1667_v55, %s3994_s22 }
 0xca7   : > { %v3630_v56 = vpop.f32.mrb[26].mxu0 }
 0xca8   : > { %1750 = vrot.lane.b32.xlu0 %v3630_v56, %s3995_s23  ;;  %v1677_v57 = vpop.f32.mrb[27].mxu0  ;;  %v3310_v56 = vld [vmem:[%s4779_s1 + $0x1c0] ss:$0 sm:$0xff] }
 0xca9   : > { %1748 = vrot.lane.b32.xlu1 %v1677_v57, %s3995_s23 }
 0xcab   : > { %v3633_v58 = vpop.f32.mrb[28].mxu0 }
 0xcac   : > { %1758 = vrot.lane.b32.xlu0 %v3633_v58, %s3996_s24  ;;  %v1687_v59 = vpop.f32.mrb[29].mxu0 }
 0xcad   : > { %1756 = vrot.lane.b32.xlu1 %v1687_v59, %s3996_s24 }
 0xcaf   : > { %v3636_v60 = vpop.f32.mrb[30].mxu0 }
 0xcb0   : > { %1766 = vrot.lane.b32.xlu0 %v3636_v60, %s3997_s26  ;;  %v1697_v61 = vpop.f32.mrb[31].mxu0 }
 0xcb1   : > { %1764 = vrot.lane.b32.xlu1 %v1697_v61, %s3997_s26 }
 0xd06   : > { %v1711_v62 = vpop.permute.xlu0 %1710 }
 0xd07   : > { %v1709_v20 = vpop.permute.xlu1 %1708  ;;  %v1771_v47 = vsel %vm478_vm2, %v4435_v35, %v1711_v62 }
 0xd08   : > { %v1770_v34 = vsel %vm478_vm2, %v4437_v33, %v1709_v20 }
 0xd0a   : > { %v1719_v21 = vpop.permute.xlu0 %1718 }
 0xd0b   : > { %v1717_v22 = vpop.permute.xlu1 %1716  ;;  %v1773_v46 = vsel %vm388_vm1, %v1771_v47, %v1719_v21 }
 0xd0c   : > { %v1772_v36 = vsel %vm388_vm1, %v1770_v34, %v1717_v22  ;;  %v1911_v22 = vld [vmem:[%s4779_s1 + $0x1d8] sm:$0xff] }
 0xd0e   : > { %v1727_v23 = vpop.permute.xlu0 %1726 }
 0xd0f   : > { %v1725_v26 = vpop.permute.xlu1 %1724  ;;  %v1775_v18 = vsel %vm1136_vm11, %v1773_v46, %v1727_v23 }
 0xd10   : > { %v1774_v38 = vsel %vm1136_vm11, %v1772_v36, %v1725_v26  ;;  %vm4503_vm11 = vmpackc.low %vm388_vm1, %vm388_vm1 }
 0xd12   : > { %v1735_v27 = vpop.permute.xlu0 %1734 }
 0xd13   : > { %v1733_v28 = vpop.permute.xlu1 %1732  ;;  %v1777_v33 = vsel %vm297_vm0, %v1775_v18, %v1735_v27  ;;  %v1995_v18 = vld [vmem:[%s4779_s1 + $0x1c8] sm:$0xff] }
 0xd14   : > { %v1776_v41 = vsel %vm297_vm0, %v1774_v38, %v1733_v28 }
 0xd16   : > { %v1743_v29 = vpop.permute.xlu0 %1742 }
 0xd17   : > { %v1741_v19 = vpop.permute.xlu1 %1740  ;;  %v1780_v35 = vsel %vm1778_vm8, %v1777_v33, %v1743_v29 }
 0xd18   : > { %v1779_v42 = vsel %vm1778_vm8, %v1776_v41, %v1741_v19  ;;  %vm2423_vm8 = vcmask 916480   ;;  %v3354_v41 = vld [vmem:[%s4779_s1 + $0x2e0] ss:$0 sm:$0xff] }
 0xd1a   : > { %v1751_v30 = vpop.permute.xlu0 %1750 }
 0xd1b   : > { %v1749_v31 = vpop.permute.xlu1 %1748  ;;  %v1783_v45 = vsel %vm1781_vm9, %v1780_v35, %v1751_v30  ;;  %v2102_v35 = vld [vmem:[%s4779_s1 + $0x1f0] sm:$0xff] }
 0xd1c   : > { %v1782_v43 = vsel %vm1781_vm9, %v1779_v42, %v1749_v31  ;;  %v1996_v42 = vld [vmem:[%s4779_s1 + $0x1d0] sm:$0xff] }
 0xd1e   : > { %v1759_v32 = vpop.permute.xlu0 %1758 }
 0xd1f   : > { %v1757_v40 = vpop.permute.xlu1 %1756  ;;  %v1786_v50 = vsel %vm1784_vm10, %v1783_v45, %v1759_v32 }
 0xd20   : > { %v1785_v48 = vsel %vm1784_vm10, %v1782_v43, %v1757_v40  ;;  %v2103_v43 = vld [vmem:[%s4779_s1 + $0x1f8] sm:$0xff] }
 0xd21   : > { %v3797_v45 = vpack.c.bf16 %v2103_v43, %v2102_v35 }
 0xd22   : > { %v1767_v44 = vpop.permute.xlu0 %1766 }
 0xd23   : > { %v1765_v49 = vpop.permute.xlu1 %1764  ;;  %v1789_v55 = vsel %vm1787_vm12, %v1786_v50, %v1767_v44  ;;  %v2104_v44 = vld [vmem:[%s4779_s1 + $0x200] sm:$0xff]  ;;  %v3319_v50 = vld [vmem:[%s4779_s1 + $0x1e8] ss:$0 sm:$0xff] }
 0xd24   : > { %v1788_v51 = vsel %vm1787_vm12, %v1785_v48, %v1765_v49  ;;  %v2105_v48 = vld [vmem:[%s4779_s1 + $0x208] sm:$0xff] }
 0xd25   : > { %3655 = vmatprep.mubr.msk.f32.mxu1 %vm1804_vm13, %v1788_v51  ;;  %v3801_v49 = vpack.c.bf16 %v2105_v48, %v2104_v44  ;;  %v2442_v44 = vld [vmem:[%s4779_s1 + $0x298] sm:$0xff] }
 0xd26   : > { %3656 = vmatmul.mubr.msk.f32.vlgmr.msra.gmra.mrb[24].mxu1 %vm1804_vm13, %v1789_v55 }
 0xd27   : > { %3660 = vmatprep.mubr.msk.f32.mxu1 %vm478_vm2, %v1911_v22 }
 0xdf9   : > { %v3657_v57 = vpop.f32.mrb[24].mxu1 }
 0xdfa   : > { %v1883_v58 = vadd.f32 %v3657_v57, %v3310_v56  ;;  %v1877_v59 = vpop.f32.mrb[25].mxu1 }
 0xdfb   : > { %v1878_v60 = vadd.f32 %v3310_v56, %v1877_v59 }
 0xdfc   : > { %v1887_v61 = vsub.f32 0.0, %v1883_v58 }
 0xdfd   : > { %v1886_v19 = vsub.f32 0.0, %v1878_v60 }
 0xdfe   : > { %v1890_v62 = vmul.f32 1.442695, %v1887_v61 }
 0xdff   : > { %v1888_v30 = vmul.f32 1.442695, %v1886_v19 }
 0xe00   : > { %3926 = vpow2.f32 %v1890_v62 }
 0xe0a   : > { %v3927_v20 = vpop.eup %3926 }
 0xe0b   : > { %v1893_v21 = vadd.f32 1.0, %v3927_v20 }
 0xe0d   : > { %3928 = vrcp.f32 %v1893_v21  ;;  %v3320_v21 = vld [vmem:[%s4779_s1 + $0x210] ss:$0 sm:$0xff] }
 0xe0e   : > { %3930 = vpow2.f32 %v1888_v30 }
 0xe17   : > { %v3929_v23 = vpop.eup %3928 }
 0xe18   : > { %v1899_v26 = vsub.f32 1.0, %v3929_v23  ;;  %v1903_v28 = vmul.f32 %v3929_v23, %v4370_v53  ;;  %v3931_v31 = vpop.eup %3930  ;;  %v1912_v53 = vld [vmem:[%s4779_s1 + $0x1e0] sm:$0xff] }
 0xe19   : > { %v1892_v34 = vadd.f32 1.0, %v3931_v31 }
 0xe1a   : > { %v1901_v27 = vmul.f32 %v4089_v25, %v1899_v26 }
 0xe1b   : > { %3932 = vrcp.f32 %v1892_v34  ;;  %v2437_v34 = vld [vmem:[%s4779_s1 + $0x270] sm:$0xff] }
 0xe1c   : > { %v1905_v29 = vadd.f32 %v1903_v28, %v1901_v27 }
 0xe1e   : > { %1907 = vrot.lane.b32.xlu1 %v1905_v29, %s3985_s6 }
 0xe25   : > { %v3933_v47 = vpop.eup %3932 }
 0xe26   : > { %v1898_v36 = vsub.f32 1.0, %v3933_v47  ;;  %v1902_v46 = vmul.f32 %v3933_v47, %v4372_v54 }
 0xe28   : > { %v1900_v32 = vmul.f32 %v4087_v24, %v1898_v36 }
 0xe2a   : > { %v1904_v38 = vadd.f32 %v1902_v46, %v1900_v32  ;;  %v2438_v46 = vld [vmem:[%s4779_s1 + $0x278] sm:$0xff] }
 0xe90   : > { %v1908_v40 = vpop.permute.xlu1 %1907 }
 0xe91   : > { %v1910_v25 = vsel %vm478_vm2, %v1904_v38, %v1908_v40  ;;  %v2439_v38 = vld [vmem:[%s4779_s1 + $0x280] sm:$0xff] }
 0xe92   : > { %3658 = vmatprep.subr.mxu1 %v1910_v25 }
 0xe93   : > { %3659 = vmatpush3.msra.mxu1 %v1910_v25  ;;  %v3828_v25 = vpack.c.bf16 %v2439_v38, %v2438_v46 }
 0xe94   : > { %3661 = vmatmul.mubr.msk.f32.vlgmr.msra.gmra.mrb[26].mxu1 %vm478_vm2, %v1912_v53 }
 0xe95   : > { %3667 = vmatprep.mubr.msk.f32.mxu1 %vm388_vm1, %v1995_v18 }
 0xf67   : > { %v3662_v24 = vpop.f32.mrb[26].mxu1 }
 0xf68   : > { %v1985_v54 = vpop.f32.mrb[27].mxu1 }
 0xf69   : > { %v3791_v33 = vpack.c.bf16 %v3662_v24, %v1985_v54  ;;  %v2440_v24 = vld [vmem:[%s4779_s1 + $0x288] sm:$0xff]  ;;  %v2441_v54 = vld [vmem:[%s4779_s1 + $0x290] sm:$0xff] }
 0xf6b   : > { %3793 = vmatprep.subr.msk.bf16.mxu1 %vm4503_vm11, %v3791_v33 }
 0xf6c   : > { %3796 = vmatpush3.bf16.xpose.msk.msra.mxu1 %vm4503_vm11, %v3791_v33 }
 0xf6d   : > { %3798 = vmatprep.subr.bf16.mxu1 %v3797_v45 }
 0xf73   : > { %3668 = vmatmul.mubr.msk.f32.vlgmr.msra.gmra.mrb[28].mxu1 %vm388_vm1, %v1996_v42  ;;  %v3831_v42 = vpack.c.bf16 %v2441_v54, %v2440_v24 }
 0xf74   : > { %3800 = vmatpush3.bf16.msra.mxu1 %v3797_v45  ;;  %v2443_v45 = vld [vmem:[%s4779_s1 + $0x2a0] sm:$0xff] }
 0xf75   : > { %3802 = vmatprep.subr.bf16.mxu1 %v3801_v49 }
 0xf78   : > { %3804 = vmatpush3.bf16.msra.mxu1 %v3801_v49  ;;  %v3834_v49 = vpack.c.bf16 %v2443_v45, %v2442_v44 }
0x1046   : > { %v3669_v51 = vpop.f32.mrb[28].mxu1 }
0x1047   : > { %v2089_v55 = vadd.f32 %v3669_v51, %v3319_v50  ;;  %v2075_v56 = vpop.f32.mrb[29].mxu1 }
0x1048   : > { %v2088_v57 = vadd.f32 %v3319_v50, %v2075_v56 }
0x1049   : > { %3934 = vtanh.f32 %v2089_v55 }
0x104a   : > { %3936 = vtanh.f32 %v2088_v57 }
0x1053   : > { %v4530_v58 = vpop.eup %3934 }
0x1054   : > { %v4532_v59 = vpop.eup %3936  ;;  %2096 = vrot.lane.b32.xlu1 %v4530_v58, %s3987_s19 }
0x1055   : > { %2094 = vrot.lane.b32.xlu0 %v4532_v59, %s3987_s19 }
0x10c6   : > { %v2097_v60 = vpop.permute.xlu1 %2096 }
0x10c7   : > { %v2095_v61 = vpop.permute.xlu0 %2094  ;;  %v2101_v20 = vsel %vm388_vm1, %v4075_v17, %v2097_v60 }
0x10c8   : > { %v2100_v62 = vsel %vm388_vm1, %v4073_v16, %v2095_v61 }
0x10c9   : > { %3678 = vmatprep.mubr.msk.f32.mxu1 %vm297_vm0, %v2100_v62 }
0x10ca   : > { %3679 = vmatmul.mubr.msk.f32.vlgmr.msra.gmra.mrb[30].mxu1 %vm297_vm0, %v2101_v20 }
0x10cb   : > { %3685 = vmatprep.mubr.msk.f32.mxu1 %vm388_vm1, %v4158_v52  ;;  %v2426_v52 = vld [vmem:[%s4779_s1 + $0x218] sm:$0xff] }
0x119d   : > { %v3680_v22 = vpop.f32.mrb[30].mxu1 }
0x119e   : > { %v2189_v23 = vadd.f32 %v3680_v22, %v3320_v21  ;;  %v2183_v26 = vpop.f32.mrb[31].mxu1 }
0x119f   : > { %v2184_v27 = vadd.f32 %v3320_v21, %v2183_v26 }
0x11a0   : > { %vm2193_vm2 = vcmp.gt.f32.partialorder %v2189_v23, 0.0  ;;  %v2195_v28 = vmul.f32 0.01, %v2189_v23 }
0x11a1   : > { %vm2192_vm14 = vcmp.gt.f32.partialorder %v2184_v27, 0.0  ;;  %v2194_v29 = vmul.f32 0.01, %v2184_v27 }
0x11a2   : > { %v2197_v19 = vsel %vm2193_vm2, %v2189_v23, %v2195_v28 }
0x11a3   : > { %v2196_v30 = vsel %vm2192_vm14, %v2184_v27, %v2194_v29 }
0x11a4   : > { %v3805_v31 = vpack.c.bf16 %v2197_v19, %v2196_v30 }
0x11a6   : > { %3806 = vmatprep.subr.bf16.mxu1 %v3805_v31 }
0x11a7   : > { %3808 = vmatpush3.bf16.msra.mxu1 %v3805_v31 }
0x11aa   : > { %3686 = vmatmul.mubr.msk.f32.vlgmr.msra.gmra.mrb[32].mxu1 %vm388_vm1, %v4168_v63  ;;  %v2427_v63 = vld [vmem:[%s4779_s1 + $0x220] sm:$0xff] }
0x11ab   : > { %3688 = vmatprep.mubr.msk.f32.mxu1 %vm388_vm1, %v4173_v0  ;;  %v2428_v0 = vld [vmem:[%s4779_s1 + $0x228] sm:$0xff] }
0x11ae   : > { %3689 = vmatmul.mubr.msk.f32.gmra.mrb[34].mxu1 %vm388_vm1, %v4182_v1  ;;  %v3998_v1 = vmov 0.0|0.0  }
0x11af   : > { %3691 = vmatprep.mubr.msk.f32.mxu1 %vm388_vm1, %v4187_v2  ;;  %3809 = vmatprep.subr.bf16.mxu0 %v3998_v1  ;;  %v3810_v2 = vpack.c.bf16 %v2427_v63, %v2426_v52 }
0x11b1   : > { %3811 = vmatpush1.bf16.msra.mxu0 %v3810_v2 }
0x11b2   : > { %3692 = vmatmul.mubr.msk.f32.gmra.mrb[36].mxu1 %vm388_vm1, %v4196_v3  ;;  %v2429_v3 = vld [vmem:[%s4779_s1 + $0x230] sm:$0xff]  ;;  %3812 = vmatprep.subr.bf16.mxu0 %v3998_v1 }
0x11b3   : > { %3694 = vmatprep.mubr.msk.f32.mxu1 %vm388_vm1, %v4201_v4  ;;  %v3813_v4 = vpack.c.bf16 %v2429_v3, %v2428_v0 }
0x11b5   : > { %3814 = vmatpush1.bf16.msra.mxu0 %v3813_v4 }
0x11b6   : > { %3695 = vmatmul.mubr.msk.f32.gmra.mrb[38].mxu1 %vm388_vm1, %v4210_v5  ;;  %v2430_v5 = vld [vmem:[%s4779_s1 + $0x238] sm:$0xff]  ;;  %3815 = vmatprep.subr.bf16.mxu0 %v3998_v1 }
0x11b7   : > { %3697 = vmatprep.mubr.msk.f32.mxu1 %vm388_vm1, %v4215_v6  ;;  %v2431_v6 = vld [vmem:[%s4779_s1 + $0x240] sm:$0xff] }
0x11ba   : > { %3698 = vmatmul.mubr.msk.f32.gmra.mrb[40].mxu1 %vm388_vm1, %v4224_v7  ;;  %v3816_v7 = vpack.c.bf16 %v2431_v6, %v2430_v5 }
0x11bb   : > { %3700 = vmatprep.mubr.msk.f32.mxu1 %vm388_vm1, %v4229_v8  ;;  %v2432_v8 = vld [vmem:[%s4779_s1 + $0x248] sm:$0xff] }
0x11bc   : > { %3817 = vmatpush1.bf16.msra.mxu0 %v3816_v7 }
0x11bd   : > { %3818 = vmatprep.subr.bf16.mxu0 %v3998_v1 }
0x11be   : > { %3701 = vmatmul.mubr.msk.f32.gmra.mrb[42].mxu1 %vm388_vm1, %v4238_v9  ;;  %v2433_v9 = vld [vmem:[%s4779_s1 + $0x250] sm:$0xff] }
0x11bf   : > { %3703 = vmatprep.mubr.msk.f32.mxu1 %vm388_vm1, %v4243_v10  ;;  %v3819_v10 = vpack.c.bf16 %v2433_v9, %v2432_v8 }
0x11c1   : > { %3820 = vmatpush1.bf16.msra.mxu0 %v3819_v10 }
0x11c2   : > { %3704 = vmatmul.mubr.msk.f32.gmra.mrb[44].mxu1 %vm388_vm1, %v4252_v11  ;;  %3821 = vmatprep.subr.bf16.mxu0 %v3998_v1  ;;  %v2434_v11 = vld [vmem:[%s4779_s1 + $0x258] sm:$0xff] }
0x11c3   : > { %3706 = vmatprep.mubr.msk.f32.mxu1 %vm388_vm1, %v4257_v12  ;;  %v2435_v12 = vld [vmem:[%s4779_s1 + $0x260] sm:$0xff] }
0x11c6   : > { %3707 = vmatmul.mubr.msk.f32.gmra.mrb[46].mxu1 %vm388_vm1, %v4266_v13  ;;  %v3822_v13 = vpack.c.bf16 %v2435_v12, %v2434_v11 }
0x11c7   : > { %3709 = vmatprep.mubr.msk.f32.mxu1 %vm388_vm1, %v4271_v14 }
0x11c8   : > { %3823 = vmatpush1.bf16.msra.mxu0 %v3822_v13 }
0x11c9   : > { %3824 = vmatprep.subr.bf16.mxu0 %v3998_v1 }
0x11ca   : > { %3710 = vmatmul.mubr.msk.f32.gmra.mrb[48].mxu1 %vm388_vm1, %v4280_v15  ;;  %v2436_v15 = vld [vmem:[%s4779_s1 + $0x268] sm:$0xff] }
0x11cb   : > { %v3825_v36 = vpack.c.bf16 %v2437_v34, %v2436_v15 }
0x11cd   : > { %3826 = vmatpush1.bf16.msra.mxu0 %v3825_v36 }
0x11ce   : > { %3827 = vmatprep.subr.bf16.mxu0 %v3998_v1 }
0x11d1   : > { %3829 = vmatpush1.bf16.msra.mxu0 %v3828_v25  ;;  %v2550_v25 = vld [vmem:[%s4779_s1 + $0x2c0] sm:$0xff] }
0x11d2   : > { %3830 = vmatprep.subr.bf16.mxu0 %v3998_v1 }
0x11d5   : > { %3832 = vmatpush1.bf16.msra.mxu0 %v3831_v42 }
0x11d6   : > { %3833 = vmatprep.subr.bf16.mxu0 %v3998_v1 }
0x11d9   : > { %3835 = vmatpush1.bf16.msra.mxu0 %v3834_v49 }
0x127d   : > { %v4613_v14 = vpop.f32.mrb[32].mxu1 }
0x127e   : > { %v2264_v47 = vpop.f32.mrb[33].mxu1 }
0x1281   : > { %v3690_v32 = vpop.f32.mrb[34].mxu1 }
0x1282   : > { %v2274_v40 = vpop.f32.mrb[35].mxu1 }
0x1283   : > { %v3878_v53 = vpack.i.bf16 %v3690_v32, %v2274_v40 }
0x1285   : > { %3879 = vrot.lane.b32.xlu0 %v3878_v53, %s3987_s19  ;;  %v3693_v18 = vpop.f32.mrb[36].mxu1  ;;  %v3341_v53 = vld [vmem:[%s4779_s1 + $0x2a8] ss:$0 sm:$0xff] }
0x1286   : > { %v2284_v33 = vpop.f32.mrb[37].mxu1 }
0x1287   : > { %v3883_v35 = vpack.i.bf16 %v3693_v18, %v2284_v33 }
0x1289   : > { %3884 = vrot.lane.b32.xlu1 %v3883_v35, %s3991_s25  ;;  %v3696_v43 = vpop.f32.mrb[38].mxu1  ;;  %s3999_s25 = smov 80  }
0x128a   : > { %v2294_v48 = vpop.f32.mrb[39].mxu1 }
0x128b   : > { %v3888_v50 = vpack.i.bf16 %v3696_v43, %v2294_v48 }
0x128d   : > { %3889 = vrot.lane.b32.xlu0 %v3888_v50, %s3995_s23  ;;  %v3699_v51 = vpop.f32.mrb[40].mxu1 }
0x128e   : > { %v2304_v55 = vpop.f32.mrb[41].mxu1 }
0x128f   : > { %v3893_v56 = vpack.i.bf16 %v3699_v51, %v2304_v55 }
0x1291   : > { %3894 = vrot.lane.b32.xlu1 %v3893_v56, %s3997_s26  ;;  %v3702_v57 = vpop.f32.mrb[42].mxu1 }
0x1292   : > { %v2314_v60 = vpop.f32.mrb[43].mxu1 }
0x1293   : > { %2387 = vrot.lane.b32.xlu0 %v2314_v60, %s3999_s25 }
0x1295   : > { %v3705_v61 = vpop.f32.mrb[44].mxu1 }
0x1296   : > { %v2324_v62 = vpop.f32.mrb[45].mxu1 }
0x1297   : > { %2395 = vrot.lane.b32.xlu1 %v2324_v62, %s4000_s11 }
0x1299   : > { %v3708_v20 = vpop.f32.mrb[46].mxu1 }
0x129a   : > { %v2334_v21 = vpop.f32.mrb[47].mxu1 }
0x129b   : > { %2389 = vrot.lane.b32.xlu1 %v3702_v57, %s3999_s25  ;;  %2403 = vrot.lane.b32.xlu0 %v2334_v21, %s4001_s8  ;;  %s254_s25 = scalar_lea.vmem %s4781_s3, %s4052_s29 }
0x129d   : > { %v3711_v22 = vpop.f32.mrb[48].mxu1 }
0x129e   : > { %v2344_v23 = vpop.f32.mrb[49].mxu1 }
0x129f   : > { %2405 = vrot.lane.b32.xlu1 %v3708_v20, %s4001_s8  ;;  %2397 = vrot.lane.b32.xlu0 %v3705_v61, %s4000_s11 }
0x12a0   : > { %3342 = vmatprep.mubr.msk.f32.mxu0 %vm388_vm1, %v2344_v23 }
0x12f7   : > { %v3880_v26 = vpop.permute.xlu0 %3879 }
0x12f8   : > { %v3881_v29 = vunpack.i.l.bf16 %v3880_v26  ;;  %v3882_v2 = vunpack.i.h.bf16 %v3880_v26 }
0x12fa   : > { %v2409_v63 = vsel %vm388_vm1, %v2264_v47, %v3881_v29  ;;  %v2410_v10 = vsel %vm388_vm1, %v4613_v14, %v3882_v2 }
0x12fb   : > { %v3885_v27 = vpop.permute.xlu1 %3884 }
0x12fc   : > { %v3886_v19 = vunpack.i.l.bf16 %v3885_v27  ;;  %v3887_v6 = vunpack.i.h.bf16 %v3885_v27 }
0x12fe   : > { %v2411_v0 = vsel %vm297_vm0, %v2409_v63, %v3886_v19  ;;  %v2412_v15 = vsel %vm297_vm0, %v2410_v10, %v3887_v6  ;;  %v3975_v19 = vld [vmem:[%s4058_s7 + $0x8] sm:$0xff]  ;;  %v2653_v6 = vld [vmem:[%s4779_s1 + $0x2b8] sm:$0xff] }
0x12ff   : > { %v3890_v28 = vpop.permute.xlu0 %3889 }
0x1300   : > { %v3891_v31 = vunpack.i.l.bf16 %v3890_v28  ;;  %v3892_v7 = vunpack.i.h.bf16 %v3890_v28  ;;  %v2551_v28 = vld [vmem:[%s4779_s1 + $0x2c8] sm:$0xff] }
0x1302   : > { %v2413_v1 = vsel %vm1781_vm9, %v2411_v0, %v3891_v31  ;;  %v2414_v47 = vsel %vm1781_vm9, %v2412_v15, %v3892_v7 }
0x1303   : > { %v3895_v30 = vpop.permute.xlu1 %3894 }
0x1304   : > { %v3896_v52 = vunpack.i.l.bf16 %v3895_v30  ;;  %v3897_v8 = vunpack.i.h.bf16 %v3895_v30  ;;  %v2762_v30 = vmul.f32 %v3975_v19, %v3975_v19 }
0x1305   : > { %v2388_v4 = vpop.permute.xlu0 %2387 }
0x1306   : > { %v2415_v3 = vsel %vm1787_vm12, %v2413_v1, %v3896_v52  ;;  %v2416_v36 = vsel %vm1787_vm12, %v2414_v47, %v3897_v8  ;;  %v2766_v52 = vsel %vm297_vm0, %v2762_v30, 0.0 }
0x1307   : > { %v2418_v9 = vsel %vm2417_vm15, %v2415_v3, %v2388_v4 }
0x1309   : > { %v2396_v5 = vpop.permute.xlu1 %2395 }
0x130a   : > { %v2421_v11 = vsel %vm2420_vm7, %v2418_v9, %v2396_v5  ;;  %v2839_v5 = vld [vmem:[%s4779_s1 + $0x2e8] sm:$0x3] }
0x130d   : > { %v2390_v12 = vpop.permute.xlu1 %2389  ;;  %v2404_v13 = vpop.permute.xlu0 %2403 }
0x130e   : > { %v2424_v34 = vsel %vm2423_vm8, %v2421_v11, %v2404_v13  ;;  %v2419_v32 = vsel %vm2417_vm15, %v2416_v36, %v2390_v12 }
0x130f   : > { %2520 = vmatmul.mubr.f32.vlgmr.msra.gmra.mrb[32].mxu0 %v2424_v34 }
0x1310   : > { %3343 = vmatprep.mubr.msk.f32.mxu0 %vm388_vm1, %v3711_v22 }
0x1311   : > { %v2406_v46 = vpop.permute.xlu1 %2405  ;;  %v2398_v38 = vpop.permute.xlu0 %2397 }
0x1312   : > { %v2422_v14 = vsel %vm2420_vm7, %v2419_v32, %v2398_v38  ;;  %vm3061_vm7 = vcmask 23552  }
0x1313   : > { %v2425_v40 = vsel %vm2423_vm8, %v2422_v14, %v2406_v46 }
0x1314   : > { %2525 = vmatmul.mubr.f32.gmra.mrb[34].mxu0 %v2425_v40 }
0x1315   : > { %3716 = vmatprep.mubr.msk.f32.mxu0 %vm388_vm1, %v2550_v25 }
0x13e2   : > { %v2521_v18 = vpop.f32.mrb[32].mxu0 }
0x13e3   : > { %v2522_v24 = vadd.f32 %v3341_v53, %v2521_v18  ;;  %v2523_v54 = vpop.f32.mrb[33].mxu0 }
0x13e5   : > { %v2530_v33 = vsub.f32 0.0, %v2522_v24 }
0x13e7   : > { %v2532_v42 = vmul.f32 1.442695, %v2530_v33  ;;  %v2526_v35 = vpop.f32.mrb[34].mxu0 }
0x13e8   : > { %v2527_v43 = vadd.f32 %v3341_v53, %v2526_v35  ;;  %v2528_v44 = vpop.f32.mrb[35].mxu0 }
0x13e9   : > { %3938 = vpow2.f32 %v2532_v42  ;;  %v2943_v42 = vld [vmem:[%s4779_s1 + $0x308] sm:$0xf] }
0x13ea   : > { %v2531_v45 = vsub.f32 0.0, %v2527_v43 }
0x13ec   : > { %v2534_v48 = vmul.f32 1.442695, %v2531_v45 }
0x13ee   : > { %3940 = vpow2.f32 %v2534_v48 }
0x13f3   : > { %v3939_v49 = vpop.eup %3938 }
0x13f4   : > { %v2536_v50 = vadd.f32 1.0, %v3939_v49 }
0x13f6   : > { %3942 = vrcp.f32 %v2536_v50 }
0x13f8   : > { %v3941_v51 = vpop.eup %3940 }
0x13f9   : > { %v2537_v55 = vadd.f32 1.0, %v3941_v51 }
0x13fb   : > { %3944 = vrcp.f32 %v2537_v55 }
0x1400   : > { %v3943_v56 = vpop.eup %3942 }
0x1401   : > { %v2542_v57 = vsub.f32 1.0, %v3943_v56  ;;  %v2546_v21 = vmul.f32 %v3943_v56, %v4532_v59  ;;  %v3974_v59 = vld [vmem:[%s4058_s7] sm:$0xff] }
0x1402   : > { %v2761_v29 = vmul.f32 %v3974_v59, %v3974_v59 }
0x1403   : > { %v2544_v62 = vmul.f32 %v4073_v16, %v2542_v57  ;;  %v2552_v16 = vld [vmem:[%s4779_s1 + $0x2d0] sm:$0xff] }
0x1404   : > { %v2763_v31 = vsel %vm297_vm0, %v2761_v29, 0.0 }
0x1405   : > { %v3945_v60 = vpop.eup %3944  ;;  %v2548_v23 = vadd.f32 %v2546_v21, %v2544_v62  ;;  %2764 = vadd.xlane.f32.xlu0 %v2763_v31 }
0x1406   : > { %v2543_v61 = vsub.f32 1.0, %v3945_v60  ;;  %v2547_v22 = vmul.f32 %v3945_v60, %v4530_v58  ;;  %v2652_v58 = vld [vmem:[%s4779_s1 + $0x2b0] sm:$0xff] }
0x1408   : > { %v2545_v20 = vmul.f32 %v4075_v17, %v2543_v61  ;;  %v2553_v17 = vld [vmem:[%s4779_s1 + $0x2d8] sm:$0xff] }
0x1409   : > { %2767 = vadd.xlane.f32.xlu0 %v2766_v52 }
0x140a   : > { %v2549_v26 = vadd.f32 %v2547_v22, %v2545_v20 }
0x140c   : > { %v3836_v27 = vpack.c.bf16 %v2549_v26, %v2548_v23 }
0x140e   : > { %3837 = vmatprep.subr.bf16.mxu0 %v3836_v27 }
0x140f   : > { %3839 = vmatpush3.bf16.msra.mxu0 %v3836_v27 }
0x1412   : > { %3717 = vmatmul.mubr.msk.f32.vlgmr.msra.gmra.mrb[36].mxu0 %vm388_vm1, %v2551_v28 }
0x1413   : > { %3719 = vmatprep.mubr.msk.f32.mxu0 %vm388_vm1, %v2552_v16 }
0x1416   : > { %3720 = vmatmul.mubr.msk.f32.gmra.mrb[38].mxu0 %vm388_vm1, %v2553_v17 }
0x1417   : > { %3730 = vmatprep.mubr.msk.f32.mxu0 %vm388_vm1, %v2652_v58 }
0x1492   : > { %v2765_v35 = vpop.xlane.xlu0 %2764 }
0x1493   : > { %v2774_v62 = vand.u32 2147483648, %v2765_v35 }
0x1496   : > { %v2768_v43 = vpop.xlane.xlu0 %2767 }
0x1497   : > { %3946 = vrsqrt.f32 %v2768_v43  ;;  %v2781_v60 = vand.u32 2147483648, %v2768_v43 }
0x1498   : > { %3948 = vrsqrt.f32 %v2765_v35 }
0x14a1   : > { %v3947_v49 = vpop.eup %3946 }
0x14a2   : > { %v3949_v51 = vpop.eup %3948  ;;  %v2777_v55 = vmul.f32 %v3947_v49, %v2768_v43 }
0x14a3   : > { %v2770_v56 = vmul.f32 %v3949_v51, %v2765_v35 }
0x14e5   : > { %v3718_v63 = vpop.f32.mrb[36].mxu0 }
0x14e6   : > { %v2632_v0 = vpop.f32.mrb[37].mxu0 }
0x14e7   : > { %v3840_v1 = vpack.c.bf16 %v3718_v63, %v2632_v0 }
0x14e9   : > { %3842 = vmatprep.subr.msk.bf16.mxu0 %vm4503_vm11, %v3840_v1  ;;  %v3721_v2 = vpop.f32.mrb[38].mxu0 }
0x14ea   : > { %3845 = vmatpush3.bf16.xpose.msk.msra.mxu0 %vm4503_vm11, %v3840_v1  ;;  %v2642_v3 = vpop.f32.mrb[39].mxu0 }
0x14eb   : > { %v3846_v4 = vpack.c.bf16 %v3721_v2, %v2642_v3 }
0x14ed   : > { %3848 = vmatprep.subr.msk.bf16.mxu0 %vm4503_vm11, %v3846_v4 }
0x14f2   : > { %3851 = vmatpush3.bf16.xpose.msk.msra.mxu0 %vm4503_vm11, %v3846_v4 }
0x14f3   : > { %3733 = vmatprep.subr.msk.mxu0 %vm667_vm5, %v2839_v5 }
0x14f9   : > { %3731 = vmatmul.mubr.msk.f32.vlgmr.msra.gmra.mrb[40].mxu0 %vm388_vm1, %v2653_v6  ;;  %vm2771_vm1 = vcmp.eq.f32.partialorder %v2765_v35, inf }
0x14fa   : > { %3735 = vmatprep.mubr.msk.f32.mxu0 %vm660_vm6, %v4125_v39  ;;  %3734 = vmatpush3.msk.msra.mxu0 %vm667_vm5, %v2839_v5  ;;  %vm2780_vm5 = vcmp.eq.f32.partialorder %v2768_v43, 0.0  ;;  %v2772_v22 = vsel %vm2771_vm1, %v2765_v35, %v2770_v56 }
0x14fb   : > { %3738 = vmatprep.subr.msk.mxu0 %vm575_vm3, %v2943_v42 }
0x14fd   : > { %3736 = vmatmul.mubr.msk.f32.vlgmr.msra.gmra.mrb[42].mxu0 %vm660_vm6, %v4123_v37 }
0x14fe   : > { %3739 = vmatpush3.msk.msra.mxu0 %vm575_vm3, %v2943_v42  ;;  %vm2773_vm3 = vcmp.eq.f32.partialorder %v2765_v35, 0.0 }
0x15cc   : > { %v3732_v7 = vpop.f32.mrb[40].mxu0 }
0x15cd   : > { %v2752_v8 = vadd.f32 %v3732_v7, %v3354_v41  ;;  %v2738_v9 = vpop.f32.mrb[41].mxu0  ;;  %v3355_v7 = vld [vmem:[%s4779_s1 + $0x2f0] ss:$0 sm:$0xff] }
0x15ce   : > { %v2751_v10 = vadd.f32 %v3354_v41, %v2738_v9 }
0x15cf   : > { %3058 = vst.msk [vmem:[%s254_s25 + $0x8] sm:$0xff] %vm297_vm0, %v2752_v8  ;;  %v2784_v11 = vmul.f32 %v2752_v8, %v2752_v8  ;;  %v2814_v12 = vsub.f32 %v3975_v19, %v2752_v8  ;;  %v2754_v53 = vmul.f32 %v3975_v19, %v2752_v8  ;;  %v2775_v19 = vsel %vm2773_vm3, %v2774_v62, %v2772_v22 }
0x15d0   : > { %3057 = vst.msk [vmem:[%s254_s25] sm:$0xff] %vm297_vm0, %v2751_v10  ;;  %v4721_v13 = vpop.f32.mrb[42].mxu0  ;;  %v2783_v15 = vmul.f32 %v2751_v10, %v2751_v10  ;;  %v2813_v34 = vsub.f32 %v3974_v59, %v2751_v10  ;;  %v2753_v24 = vmul.f32 %v3974_v59, %v2751_v10 }
0x15d1   : > { %v4723_v47 = vpop.f32.mrb[43].mxu0  ;;  %v2788_v36 = vsel %vm297_vm0, %v2784_v11, 0.0  ;;  %v2816_v32 = vadd.f32 1e-06, %v2814_v12  ;;  %v2758_v54 = vsel %vm297_vm0, %v2754_v53, 0.0 }
0x15d2   : > { %2789 = vadd.xlane.f32.xlu0 %v2788_v36  ;;  %v2785_v46 = vsel %vm297_vm0, %v2783_v15, 0.0  ;;  %v2815_v38 = vadd.f32 1e-06, %v2813_v34  ;;  %v2755_v33 = vsel %vm297_vm0, %v2753_v24, 0.0  ;;  %v3359_v11 = vld [vmem:[%s4779_s1 + $0x2f8] ss:$0 sm:$0xff] }
0x15d3   : > { %2786 = vadd.xlane.f32.xlu1 %v2785_v46  ;;  %v2818_v14 = vmul.f32 %v2816_v32, %v2816_v32 }
0x15d4   : > { %v2817_v40 = vmul.f32 %v2815_v38, %v2815_v38 }
0x15d5   : > { %v2822_v25 = vsel %vm297_vm0, %v2818_v14, 0.0 }
0x15d6   : > { %2823 = vadd.xlane.f32.xlu0 %v2822_v25  ;;  %v2819_v18 = vsel %vm297_vm0, %v2817_v40, 0.0  ;;  %vm2778_vm0 = vcmp.eq.f32.partialorder %v2768_v43, inf }
0x15d7   : > { %2820 = vadd.xlane.f32.xlu1 %v2819_v18  ;;  %v2779_v20 = vsel %vm2778_vm0, %v2768_v43, %v2777_v55  ;;  %v3360_v18 = vld [vmem:[%s4779_s1 + $0x300] ss:$0 sm:$0xff] }
0x15d8   : > { %v2782_v17 = vsel %vm2780_vm5, %v2781_v60, %v2779_v20 }
0x15da   : > { %2759 = vadd.xlane.f32.xlu0 %v2758_v54 }
0x15db   : > { %2756 = vadd.xlane.f32.xlu1 %v2755_v33 }
0x165f   : > { %v2790_v44 = vpop.xlane.xlu0 %2789 }
0x1660   : > { %3950 = vrsqrt.f32 %v2790_v44  ;;  %v2787_v45 = vpop.xlane.xlu1 %2786  ;;  %vm2800_vm9 = vcmp.eq.f32.partialorder %v2790_v44, inf  ;;  %v2803_v23 = vand.u32 2147483648, %v2790_v44  ;;  %vm2802_vm10 = vcmp.eq.f32.partialorder %v2790_v44, 0.0 }
0x1661   : > { %3952 = vrsqrt.f32 %v2787_v45  ;;  %vm2793_vm12 = vcmp.eq.f32.partialorder %v2787_v45, inf  ;;  %v2796_v28 = vand.u32 2147483648, %v2787_v45  ;;  %vm2795_vm13 = vcmp.eq.f32.partialorder %v2787_v45, 0.0 }
0x1663   : > { %v2824_v48 = vpop.xlane.xlu0 %2823 }
0x1664   : > { %v2821_v50 = vpop.xlane.xlu1 %2820  ;;  %3954 = vrsqrt.f32 %v2824_v48  ;;  %vm2834_vm11 = vcmp.eq.f32.partialorder %v2824_v48, inf  ;;  %v2837_v4 = vand.u32 2147483648, %v2824_v48  ;;  %vm2836_vm14 = vcmp.eq.f32.partialorder %v2824_v48, 0.0 }
0x1665   : > { %3956 = vrsqrt.f32 %v2821_v50  ;;  %vm2827_vm2 = vcmp.eq.f32.partialorder %v2821_v50, inf  ;;  %v2830_v6 = vand.u32 2147483648, %v2821_v50  ;;  %vm2829_vm15 = vcmp.eq.f32.partialorder %v2821_v50, 0.0 }
0x1667   : > { %v2760_v12 = vpop.xlane.xlu0 %2759 }
0x1668   : > { %v2757_v32 = vpop.xlane.xlu1 %2756 }
0x166a   : > { %v3951_v57 = vpop.eup %3950 }
0x166b   : > { %v3953_v61 = vpop.eup %3952  ;;  %v2799_v21 = vmul.f32 %v3951_v57, %v2790_v44 }
0x166c   : > { %v2792_v26 = vmul.f32 %v3953_v61, %v2787_v45 }
0x166d   : > { %v2801_v27 = vsel %vm2800_vm9, %v2790_v44, %v2799_v21 }
0x166e   : > { %v2794_v16 = vsel %vm2793_vm12, %v2787_v45, %v2792_v26  ;;  %v2804_v58 = vsel %vm2802_vm10, %v2803_v23, %v2801_v27  ;;  %v3955_v59 = vpop.eup %3954 }
0x166f   : > { %v2806_v29 = vmul.f32 %v2804_v58, %v2782_v17  ;;  %v2797_v30 = vsel %vm2795_vm13, %v2796_v28, %v2794_v16  ;;  %v3957_v31 = vpop.eup %3956  ;;  %v2833_v0 = vmul.f32 %v3955_v59, %v2824_v48 }
0x1670   : > { %v2805_v52 = vmul.f32 %v2797_v30, %v2775_v19  ;;  %v2826_v2 = vmul.f32 %v3957_v31, %v2821_v50 }
0x1671   : > { %v2808_v63 = vmax.f32 %v2806_v29, 1e-08  ;;  %v2835_v3 = vsel %vm2834_vm11, %v2824_v48, %v2833_v0 }
0x1672   : > { %v2807_v1 = vmax.f32 %v2805_v52, 1e-08  ;;  %v2828_v5 = vsel %vm2827_vm2, %v2821_v50, %v2826_v2  ;;  %v2838_v41 = vsel %vm2836_vm14, %v2837_v4, %v2835_v3 }
0x1673   : > { %3958 = vrcp.f32 %v2808_v63  ;;  %v2831_v8 = vsel %vm2829_vm15, %v2830_v6, %v2828_v5  ;;  %v2846_v9 = vmul.f32 %v3355_v7, %v2838_v41  ;;  %v3060_v46 = vsel %vm660_vm6, %v4123_v37, %v2838_v41 }
0x1674   : > { %3960 = vrcp.f32 %v2807_v1  ;;  %v2845_v15 = vmul.f32 %v3355_v7, %v2831_v8  ;;  %v3059_v53 = vsel %vm660_vm6, %v4125_v39, %v2831_v8 }
0x1675   : > { %v2922_v14 = vadd.f32 %v4721_v13, %v2846_v9 }
0x1676   : > { %v2917_v24 = vadd.f32 %v4723_v47, %v2845_v15  ;;  %v3361_v47 = vld [vmem:[%s4779_s1 + $0x310] ss:$0 sm:$0xff] }
0x167d   : > { %v3959_v10 = vpop.eup %3958 }
0x167e   : > { %v3961_v34 = vpop.eup %3960  ;;  %v2812_v36 = vmul.f32 %v3959_v10, %v2760_v12 }
0x167f   : > { %v2810_v38 = vmul.f32 %v3961_v34, %v2757_v32 }
0x1680   : > { %v2931_v40 = vmul.f32 %v3359_v11, %v2812_v36  ;;  %v3063_v25 = vsel %vm3061_vm7, %v3060_v46, %v2812_v36 }
0x1681   : > { %3065 = vst.msk [vmem:[%s260_s13 + $0x8] sm:$0xff] %vm568_vm4, %v3063_v25  ;;  %v2930_v54 = vmul.f32 %v3359_v11, %v2810_v38  ;;  %v3062_v37 = vsel %vm3061_vm7, %v3059_v53, %v2810_v38 }
0x1682   : > { %v2933_v33 = vadd.f32 %v2931_v40, %v2922_v14  ;;  %3064 = vst.msk [vmem:[%s260_s13] sm:$0xff] %vm568_vm4, %v3062_v37 }
0x1683   : > { %v2932_v13 = vadd.f32 %v2930_v54, %v2917_v24 }
0x1684   : > { %v2940_v42 = vadd.f32 %v3360_v18, %v2933_v33 }
0x1685   : > { %v2939_v35 = vadd.f32 %v3360_v18, %v2932_v13 }
0x1687   : > { %3962 = vtanh.f32 %v2939_v35 }
0x1688   : > { %3964 = vtanh.f32 %v2940_v42 }
0x1691   : > { %v3963_v39 = vpop.eup %3962 }
0x1692   : > { %v3965_v43 = vpop.eup %3964  ;;  %3740 = vmatprep.mubr.msk.f32.mxu0 %vm568_vm4, %v3963_v39 }
0x1693   : > { %3741 = vmatmul.mubr.msk.f32.vlgmr.msra.gmra.mrb[44].mxu0 %vm568_vm4, %v3965_v43 }
0x1766   : > { %v3742_v44 = vpop.f32.mrb[44].mxu0 }
0x1767   : > { %v3030_v45 = vadd.f32 %v3742_v44, %v3361_v47  ;;  %v3024_v48 = vpop.f32.mrb[45].mxu0 }
0x1768   : > { %v3025_v49 = vadd.f32 %v3361_v47, %v3024_v48 }
0x1769   : > { %v3036_v50 = vsel %vm568_vm4, %v3030_v45, -inf }
0x176a   : > { %3037 = vmax.xlane.f32.xlu0 %v3036_v50  ;;  %v3033_v51 = vsel %vm568_vm4, %v3025_v49, -inf }
0x176b   : > { %3034 = vmax.xlane.f32.xlu1 %v3033_v51 }
0x17f7   : > { %v3038_v55 = vpop.xlane.xlu0 %3037 }
0x17f8   : > { %v3040_v56 = vsub.f32 %v3030_v45, %v3038_v55  ;;  %v3035_v57 = vpop.xlane.xlu1 %3034 }
0x17f9   : > { %v3039_v60 = vsub.f32 %v3025_v49, %v3035_v57 }
0x17fa   : > { %v3043_v61 = vmul.f32 1.442695, %v3040_v56 }
0x17fb   : > { %v3041_v62 = vmul.f32 1.442695, %v3039_v60 }
0x17fc   : > { %3966 = vpow2.f32 %v3043_v61 }
0x17fd   : > { %3968 = vpow2.f32 %v3041_v62 }
0x1806   : > { %v3967_v20 = vpop.eup %3966 }
0x1807   : > { %v3969_v21 = vpop.eup %3968  ;;  %v3048_v22 = vsel %vm568_vm4, %v3967_v20, 0.0 }
0x1808   : > { %3049 = vadd.xlane.f32.xlu0 %v3048_v22  ;;  %v3045_v23 = vsel %vm568_vm4, %v3969_v21, 0.0 }
0x1809   : > { %3046 = vadd.xlane.f32.xlu1 %v3045_v23 }
0x1895   : > { %v3050_v26 = vpop.xlane.xlu0 %3049 }
0x1896   : > { %3970 = vrcp.f32 %v3050_v26  ;;  %v3047_v27 = vpop.xlane.xlu1 %3046 }
0x1897   : > { %3972 = vrcp.f32 %v3047_v27 }
0x18a0   : > { %v3971_v28 = vpop.eup %3970 }
0x18a1   : > { %v3973_v16 = vpop.eup %3972  ;;  %v3054_v17 = vmul.f32 %v3971_v28, %v3967_v20 }
0x18a2   : > { %v3052_v58 = vmul.f32 %v3973_v16, %v3969_v21 }
0x18a3   : > { %3067 = vst.msk [vmem:[%s266_s21 + $0x8] sm:$0xff] %vm568_vm4, %v3054_v17 }
0x18a4   : > { %3066 = vst.msk [vmem:[%s266_s21] sm:$0xff] %vm568_vm4, %v3052_v58 }
0x18a5 PF: > { %s16_s18 = sadd.s32 1, %s3982_s18  }
0x18a6   : > { %p13_p4 = scmp.ge.s32.totalorder %s16_s18, 10  }
0x18a8   :  { %15 = sbr.rel (!%p13_p4) target bundleno = 1 (0x1), region = 94 }

</bundles_post_ra>
